<compile_context>
chip_gen: v7x
topology: tpu7x:2x2x1
jax: 0.10.0
libtpu: 0.0.40
codegen_flags: <defaults>
</compile_context>

<pallas_src>
import functools

import jax
import jax.numpy as jnp
from jax.experimental import pallas as pl
from jax.experimental.pallas import tpu as pltpu

EPS = 1e-5
VMEM_LIMIT = 32 * 1024 * 1024


def _conv3x3_stats_kernel(x_ref, w_ref, scale_ref, shift_ref,
                          y_ref, stats_ref,
                          pad_scr, patch_scr,
                          *, H, W, apply_act):
    """One image per grid step: [optional bn+relu] -> 3x3 conv (bf16 MXU) -> stats.

    x_ref     : (1, H*W, Cin)      conv input (raw pre-BN if apply_act=True)
    w_ref     : (3, 3*Cin, Cout)   bf16 weights, per kh: row index = kw*Cin + ci
    scale_ref : (1, Cin)           folded BN scale (gamma * rsqrt(var+eps))
    shift_ref : (1, Cin)           folded BN shift (beta - mean*scale)
    y_ref     : (1, H*W, Cout)     raw conv output, stored bf16
    stats_ref : (1, 2, Cout)       [mean, centered sum of squares] per image (f32)
    pad_scr   : (H+2, W+2, Cin)    bf16 zero-padded image scratch
    patch_scr : (H+2, W, 3*Cin)    bf16 kw-folded im2col scratch
    """
    Cin = x_ref.shape[-1]
    Cout = w_ref.shape[-1]

    x = x_ref[...].reshape(H * W, Cin)
    if apply_act:
        # bn1 + relu fused into conv2's input read (scale/shift precomputed, f32).
        x = jnp.maximum(x.astype(jnp.float32) * scale_ref[...] + shift_ref[...], 0.0)
    xb = x.astype(jnp.bfloat16).reshape(H, W, Cin)

    # Zero-padded image built as one value-level concat + one unmasked store:
    # no per-step masked border-column stores, no cross-step scratch reuse.
    zc = jnp.zeros((H, 1, Cin), jnp.bfloat16)
    zr = jnp.zeros((1, W + 2, Cin), jnp.bfloat16)
    xw = jnp.concatenate([zc, xb, zc], axis=1)                    # (H,   W+2, Cin)
    pad_scr[...] = jnp.concatenate([zr, xw, zr], axis=0)          # (H+2, W+2, Cin)

    # im2col, kw taps only (3 slab copies, zero-cost ref slices, no reshapes):
    #   patch[r, w, kw*Cin + ci] = pad[r, w + kw, ci]
    for kw in range(3):
        patch_scr[:, :, kw * Cin:(kw + 1) * Cin] = pad_scr[:, kw:kw + W, :]

    # kh taps = contiguous leading-row offsets -> 3 bf16 MXU matmuls, f32 acc.
    acc = jnp.dot(patch_scr[0:H].reshape(H * W, 3 * Cin), w_ref[0],
                  preferred_element_type=jnp.float32)
    for kh in (1, 2):
        acc = acc + jnp.dot(patch_scr[kh:kh + H].reshape(H * W, 3 * Cin),
                            w_ref[kh], preferred_element_type=jnp.float32)

    # Store activation in bf16 (HBM-traffic cut); stats from the f32 accumulator.
    y_ref[...] = acc.reshape(1, H * W, Cout).astype(y_ref.dtype)

    m = jnp.mean(acc, axis=0, keepdims=True)                      # (1, Cout)
    d = acc - m
    css = jnp.sum(d * d, axis=0, keepdims=True)                   # (1, Cout)
    stats_ref[...] = jnp.concatenate([m, css], axis=0).reshape(1, 2, Cout)


def _bn_add_relu_kernel(y_ref, res_ref, scale_ref, shift_ref, out_ref):
    """out = relu(bn2(conv2_raw) + identity) on a lane-dense (rows, LW) view."""
    out_ref[...] = jnp.maximum(
        y_ref[...].astype(jnp.float32) * scale_ref[...] + shift_ref[...]
        + res_ref[...], 0.0)


def _conv3x3_bn_stats(x_flat, w, scale, shift, *, H, W, apply_act):
    """Gridded conv + per-image stats.  x_flat: (N, H*W, Cin); w: (3, 3*Cin, Cout) bf16."""
    N, HW, Cin = x_flat.shape
    Cout = w.shape[-1]
    kernel = functools.partial(_conv3x3_stats_kernel, H=H, W=W,
                               apply_act=apply_act)
    y, stats = pl.pallas_call(
        kernel,
        grid=(N,),
        in_specs=[
            pl.BlockSpec((1, HW, Cin), lambda n: (n, 0, 0)),
            pl.BlockSpec((3, 3 * Cin, Cout), lambda n: (0, 0, 0)),
            pl.BlockSpec((1, Cin), lambda n: (0, 0)),
            pl.BlockSpec((1, Cin), lambda n: (0, 0)),
        ],
        out_specs=[
            pl.BlockSpec((1, HW, Cout), lambda n: (n, 0, 0)),
            pl.BlockSpec((1, 2, Cout), lambda n: (n, 0, 0)),
        ],
        out_shape=[
            jax.ShapeDtypeStruct((N, HW, Cout), jnp.bfloat16),
            jax.ShapeDtypeStruct((N, 2, Cout), jnp.float32),
        ],
        scratch_shapes=[
            pltpu.VMEM((H + 2, W + 2, Cin), jnp.bfloat16),
            pltpu.VMEM((H + 2, W, 3 * Cin), jnp.bfloat16),
        ],
        compiler_params=pltpu.CompilerParams(
            dimension_semantics=("parallel",),
            vmem_limit_bytes=VMEM_LIMIT),
    )(x_flat, w, scale, shift)
    return y, stats


def _finalize_bn(stats, gamma, beta, count):
    """Combine per-image (mean, centered sumsq) into batch BN scale/shift (Chan)."""
    mean_n = stats[:, 0, :]                                        # (N, C)
    css_n = stats[:, 1, :]                                         # (N, C)
    n = mean_n.shape[0]
    m = jnp.mean(mean_n, axis=0, keepdims=True)                    # (1, C)
    css = (jnp.sum(css_n, axis=0, keepdims=True)
           + count * jnp.sum((mean_n - m) ** 2, axis=0, keepdims=True))
    var = css / (n * count)                                        # biased
    rstd = jax.lax.rsqrt(var + EPS)
    scale = gamma.reshape(1, -1) * rstd
    shift = beta.reshape(1, -1) - m * scale
    return scale, shift


def _pick_row_block(rows):
    """Largest divisor of `rows` giving ~<=2MB blocks, 8-aligned, >=2 grid steps."""
    cap = min(4096, rows)
    if rows >= 16:
        cap = min(cap, rows // 2)   # keep >=2 steps so both v7x TCs get work
    for tr in range(cap, 0, -1):
        if rows % tr == 0 and (tr % 8 == 0 or tr == rows):
            return tr
    return rows


def basicblock_forward_nhwc(x_nhwc, params):
    """Fused BasicBlock, NHWC in / NHWC out (preferred end-to-end layout)."""
    N, H, W, C = x_nhwc.shape
    HW = H * W
    x_flat = x_nhwc.reshape(N, HW, C).astype(jnp.float32)

    # HWIO (3,3,Cin,Cout) -> (3 [kh], 3*Cin [kw-major], Cout), bf16 for the MXU.
    w1 = params["w1"].astype(jnp.bfloat16).reshape(3, 3 * C, C)
    w2 = params["w2"].astype(jnp.bfloat16).reshape(3, 3 * C, C)

    ones = jnp.ones((1, C), jnp.float32)
    zeros = jnp.zeros((1, C), jnp.float32)

    # Pass 1: conv1 + per-image stats.
    y1, stats1 = _conv3x3_bn_stats(x_flat, w1, ones, zeros,
                                   H=H, W=W, apply_act=False)
    scale1, shift1 = _finalize_bn(stats1, params["g1"], params["b1"], HW)

    # Pass 2: bn1 + relu (fused into input read) + conv2 + per-image stats.
    y2, stats2 = _conv3x3_bn_stats(y1, w2, scale1, shift1,
                                   H=H, W=W, apply_act=True)
    scale2, shift2 = _finalize_bn(stats2, params["g2"], params["b2"], HW)

    # Pass 3: bn2 + residual add + relu on a lane-dense 2D view (unmasked vst).
    total = N * HW * C
    if C % 128 == 0:
        lw = C                       # already lane-dense
    elif 128 % C == 0 and total % 128 == 0:
        lw = 128                     # pack 128/C pixels' channels per lane row
    else:
        lw = C                       # fallback: keep channel-last layout
    reps = lw // C
    rows = total // lw
    tr = _pick_row_block(rows)

    y2_2d = y2.reshape(rows, lw)
    x_2d = x_flat.reshape(rows, lw)
    scale2_t = jnp.tile(scale2, (1, reps))
    shift2_t = jnp.tile(shift2, (1, reps))

    out2d = pl.pallas_call(
        _bn_add_relu_kernel,
        grid=(rows // tr,),
        in_specs=[
            pl.BlockSpec((tr, lw), lambda r: (r, 0)),
            pl.BlockSpec((tr, lw), lambda r: (r, 0)),
            pl.BlockSpec((1, lw), lambda r: (0, 0)),
            pl.BlockSpec((1, lw), lambda r: (0, 0)),
        ],
        out_specs=pl.BlockSpec((tr, lw), lambda r: (r, 0)),
        out_shape=jax.ShapeDtypeStruct((rows, lw), jnp.float32),
        compiler_params=pltpu.CompilerParams(
            dimension_semantics=("parallel",),
            vmem_limit_bytes=VMEM_LIMIT),
    )(y2_2d, x_2d, scale2_t, shift2_t)

    return out2d.reshape(N, H, W, C)


def basicblock_forward(x_nchw, params):
    """PyTorch-compatible NCHW wrapper (layout transposes are host glue)."""
    x = jnp.transpose(x_nchw, (0, 2, 3, 1))
    out = basicblock_forward_nhwc(x, params)
    return jnp.transpose(out, (0, 3, 1, 2))


def basicblock_reference(x_nchw, params):
    """Pure-JAX f32 reference (lax.conv) for correctness check."""
    x = jnp.transpose(x_nchw, (0, 2, 3, 1)).astype(jnp.float32)

    def conv(a, w):
        return jax.lax.conv_general_dilated(
            a, w, window_strides=(1, 1), padding="SAME",
            dimension_numbers=("NHWC", "HWIO", "NHWC"))

    def bn(a, g, b):
        m = jnp.mean(a, axis=(0, 1, 2))
        v = jnp.mean((a - m) ** 2, axis=(0, 1, 2))
        return (a - m) * jax.lax.rsqrt(v + EPS) * g + b

    y = jax.nn.relu(bn(conv(x, params["w1"]), params["g1"], params["b1"]))
    y = bn(conv(y, params["w2"]), params["g2"], params["b2"])
    y = jax.nn.relu(y + x)
    return jnp.transpose(y, (0, 3, 1, 2))


if __name__ == "__main__":
    # Small but ResNet18-consistent shapes: batch=2, channels=64 (smallest real
    # Basicblock channel count), 16x16 spatial; in_ch == out_ch, stride=1,
    # downsample=None.
    N, C, H, W = 2, 64, 16, 16
    key = jax.random.PRNGKey(0)
    kx, kw1, kw2, kg1, kb1, kg2, kb2 = jax.random.split(key, 7)

    x = jax.random.normal(kx, (N, C, H, W), jnp.float32)

    params = {
        # conv weights in HWIO layout (3,3,Cin,Cout)
        "w1": 0.05 * jax.random.normal(kw1, (3, 3, C, C), jnp.float32),
        "w2": 0.05 * jax.random.normal(kw2, (3, 3, C, C), jnp.float32),
        # BatchNorm affine params (perturbed from gamma=1, beta=0)
        "g1": 1.0 + 0.1 * jax.random.normal(kg1, (C,), jnp.float32),
        "b1": 0.1 * jax.random.normal(kb1, (C,), jnp.float32),
        "g2": 1.0 + 0.1 * jax.random.normal(kg2, (C,), jnp.float32),
        "b2": 0.1 * jax.random.normal(kb2, (C,), jnp.float32),
    }

    out = jax.block_until_ready(basicblock_forward(x, params))
    ref = basicblock_reference(x, params)

    assert out.shape == (N, C, H, W)
    abs_err = jnp.abs(out - ref)
    max_err = float(jnp.max(abs_err))
    mean_err = float(jnp.mean(abs_err))
    # Tolerance reflects bf16 MXU operands + bf16 inter-pass activations
    # (reference is pure f32); structural bugs would show up as O(1) errors.
    assert mean_err < 1e-2, f"mean abs err {mean_err}"
    assert jnp.allclose(out, ref, atol=8e-2, rtol=8e-2), (
        f"max abs err {max_err}, mean abs err {mean_err}")

    print("KERNEL_OK")
</pallas_src>

<mosaic_0001>
module attributes {stable_mosaic.version = 11 : i64} {
  func.func @_conv3x3_stats_kernel(%arg0: i32, %arg1: memref<1x256x64xf32, #tpu.memory_space<vmem>>, %arg2: memref<3x192x64xbf16, #tpu.memory_space<vmem>>, %arg3: memref<1x64xf32, #tpu.memory_space<vmem>>, %arg4: memref<1x64xf32, #tpu.memory_space<vmem>>, %arg5: memref<1x256x64xbf16, #tpu.memory_space<vmem>>, %arg6: memref<1x2x64xf32, #tpu.memory_space<vmem>>, %arg7: memref<18x18x64xbf16, #tpu.memory_space<vmem>>, %arg8: memref<18x16x192xbf16, #tpu.memory_space<vmem>>) attributes {dimension_semantics = [#tpu.dimension_semantics<parallel>], iteration_bounds = array<i64: 2>, scalar_prefetch = 0 : i64, scratch_operands = 2 : i64, tpu.core_type = #tpu.core_type<tc>, window_params = [{transform_indices = @transform_0, window_bounds = array<i64: 1, 256, 64>}, {pipeline_mode = #tpu.pipeline_mode<synchronous>, transform_indices = @transform_1, window_bounds = array<i64: 3, 192, 64>}, {pipeline_mode = #tpu.pipeline_mode<synchronous>, transform_indices = @transform_2, window_bounds = array<i64: 1, 64>}, {pipeline_mode = #tpu.pipeline_mode<synchronous>, transform_indices = @transform_3, window_bounds = array<i64: 1, 64>}, {transform_indices = @transform_4, window_bounds = array<i64: 1, 256, 64>}, {transform_indices = @transform_5, window_bounds = array<i64: 1, 2, 64>}]} {
    %c0 = arith.constant 0 : index
    %c0_0 = arith.constant 0 : index
    %c0_1 = arith.constant 0 : index
    %0 = vector.load %arg1[%c0, %c0_0, %c0_1] : memref<1x256x64xf32, #tpu.memory_space<vmem>>, vector<1x256x64xf32>
    %1 = vector.shape_cast %0 : vector<1x256x64xf32> to vector<256x64xf32>
    %2 = arith.truncf %1 : vector<256x64xf32> to vector<256x64xbf16>
    %3 = vector.shape_cast %2 : vector<256x64xbf16> to vector<16x16x64xbf16>
    %cst = arith.constant 0.000000e+00 : bf16
    %4 = vector.broadcast %cst : bf16 to vector<16x1x64xbf16>
    %cst_2 = arith.constant 0.000000e+00 : bf16
    %5 = vector.broadcast %cst_2 : bf16 to vector<1x18x64xbf16>
    %6 = tpu.concatenate %4, %3, %4 in 1 : vector<16x1x64xbf16>, vector<16x16x64xbf16>, vector<16x1x64xbf16> -> vector<16x18x64xbf16>
    %7 = tpu.concatenate %5, %6, %5 in 0 : vector<1x18x64xbf16>, vector<16x18x64xbf16>, vector<1x18x64xbf16> -> vector<18x18x64xbf16>
    %c0_3 = arith.constant 0 : index
    %c0_4 = arith.constant 0 : index
    %c0_5 = arith.constant 0 : index
    %8 = vector.load %arg7[%c0_3, %c0_4, %c0_5] : memref<18x18x64xbf16, #tpu.memory_space<vmem>>, vector<18x18x64xbf16>
    tpu.vector_store %arg7[%c0_3, %c0_4, %c0_5], %7 {strides = array<i32>} : memref<18x18x64xbf16, #tpu.memory_space<vmem>>, vector<18x18x64xbf16>,
    %c0_6 = arith.constant 0 : index
    %c0_7 = arith.constant 0 : index
    %c0_8 = arith.constant 0 : index
    %9 = vector.load %arg7[%c0_6, %c0_7, %c0_8] : memref<18x18x64xbf16, #tpu.memory_space<vmem>>, vector<18x16x64xbf16>
    %c0_9 = arith.constant 0 : index
    %c0_10 = arith.constant 0 : index
    %c0_11 = arith.constant 0 : index
    %10 = vector.load %arg8[%c0_9, %c0_10, %c0_11] : memref<18x16x192xbf16, #tpu.memory_space<vmem>>, vector<18x16x64xbf16>
    tpu.vector_store %arg8[%c0_9, %c0_10, %c0_11], %9 {strides = array<i32>} : memref<18x16x192xbf16, #tpu.memory_space<vmem>>, vector<18x16x64xbf16>,
    %c0_12 = arith.constant 0 : index
    %c1 = arith.constant 1 : index
    %c0_13 = arith.constant 0 : index
    %11 = vector.load %arg7[%c0_12, %c1, %c0_13] : memref<18x18x64xbf16, #tpu.memory_space<vmem>>, vector<18x16x64xbf16>
    %c0_14 = arith.constant 0 : index
    %c0_15 = arith.constant 0 : index
    %c64 = arith.constant 64 : index
    %12 = vector.load %arg8[%c0_14, %c0_15, %c64] : memref<18x16x192xbf16, #tpu.memory_space<vmem>>, vector<18x16x64xbf16>
    tpu.vector_store %arg8[%c0_14, %c0_15, %c64], %11 {strides = array<i32>} : memref<18x16x192xbf16, #tpu.memory_space<vmem>>, vector<18x16x64xbf16>,
    %c0_16 = arith.constant 0 : index
    %c2 = arith.constant 2 : index
    %c0_17 = arith.constant 0 : index
    %13 = vector.load %arg7[%c0_16, %c2, %c0_17] : memref<18x18x64xbf16, #tpu.memory_space<vmem>>, vector<18x16x64xbf16>
    %c0_18 = arith.constant 0 : index
    %c0_19 = arith.constant 0 : index
    %c128 = arith.constant 128 : index
    %14 = vector.load %arg8[%c0_18, %c0_19, %c128] : memref<18x16x192xbf16, #tpu.memory_space<vmem>>, vector<18x16x64xbf16>
    tpu.vector_store %arg8[%c0_18, %c0_19, %c128], %13 {strides = array<i32>} : memref<18x16x192xbf16, #tpu.memory_space<vmem>>, vector<18x16x64xbf16>,
    %c0_20 = arith.constant 0 : index
    %c0_21 = arith.constant 0 : index
    %c0_22 = arith.constant 0 : index
    %15 = vector.load %arg8[%c0_20, %c0_21, %c0_22] : memref<18x16x192xbf16, #tpu.memory_space<vmem>>, vector<16x16x192xbf16>
    %16 = vector.shape_cast %15 : vector<16x16x192xbf16> to vector<256x192xbf16>
    %c0_23 = arith.constant 0 : index
    %c0_24 = arith.constant 0 : index
    %c0_25 = arith.constant 0 : index
    %17 = vector.load %arg2[%c0_23, %c0_24, %c0_25] : memref<3x192x64xbf16, #tpu.memory_space<vmem>>, vector<1x192x64xbf16>
    %18 = vector.shape_cast %17 : vector<1x192x64xbf16> to vector<192x64xbf16>
    %cst_26 = arith.constant dense<0.000000e+00> : vector<256x64xf32>
    %19 = tpu.matmul %16, %18, %cst_26 {dimension_numbers = #tpu.dot_dimension_numbers<[1], [0], [0], [1], [0, 0, 1, 1], [], []>} : vector<256x192xbf16>, vector<192x64xbf16>, vector<256x64xf32> -> vector<256x64xf32>
    %c1_27 = arith.constant 1 : index
    %c0_28 = arith.constant 0 : index
    %c0_29 = arith.constant 0 : index
    %20 = vector.load %arg8[%c1_27, %c0_28, %c0_29] : memref<18x16x192xbf16, #tpu.memory_space<vmem>>, vector<16x16x192xbf16>
    %21 = vector.shape_cast %20 : vector<16x16x192xbf16> to vector<256x192xbf16>
    %c1_30 = arith.constant 1 : index
    %c0_31 = arith.constant 0 : index
    %c0_32 = arith.constant 0 : index
    %22 = vector.load %arg2[%c1_30, %c0_31, %c0_32] : memref<3x192x64xbf16, #tpu.memory_space<vmem>>, vector<1x192x64xbf16>
    %23 = vector.shape_cast %22 : vector<1x192x64xbf16> to vector<192x64xbf16>
    %cst_33 = arith.constant dense<0.000000e+00> : vector<256x64xf32>
    %24 = tpu.matmul %21, %23, %cst_33 {dimension_numbers = #tpu.dot_dimension_numbers<[1], [0], [0], [1], [0, 0, 1, 1], [], []>} : vector<256x192xbf16>, vector<192x64xbf16>, vector<256x64xf32> -> vector<256x64xf32>
    %25 = arith.addf %19, %24 : vector<256x64xf32>
    %c2_34 = arith.constant 2 : index
    %c0_35 = arith.constant 0 : index
    %c0_36 = arith.constant 0 : index
    %26 = vector.load %arg8[%c2_34, %c0_35, %c0_36] : memref<18x16x192xbf16, #tpu.memory_space<vmem>>, vector<16x16x192xbf16>
    %27 = vector.shape_cast %26 : vector<16x16x192xbf16> to vector<256x192xbf16>
    %c2_37 = arith.constant 2 : index
    %c0_38 = arith.constant 0 : index
    %c0_39 = arith.constant 0 : index
    %28 = vector.load %arg2[%c2_37, %c0_38, %c0_39] : memref<3x192x64xbf16, #tpu.memory_space<vmem>>, vector<1x192x64xbf16>
    %29 = vector.shape_cast %28 : vector<1x192x64xbf16> to vector<192x64xbf16>
    %cst_40 = arith.constant dense<0.000000e+00> : vector<256x64xf32>
    %30 = tpu.matmul %27, %29, %cst_40 {dimension_numbers = #tpu.dot_dimension_numbers<[1], [0], [0], [1], [0, 0, 1, 1], [], []>} : vector<256x192xbf16>, vector<192x64xbf16>, vector<256x64xf32> -> vector<256x64xf32>
    %31 = arith.addf %25, %30 : vector<256x64xf32>
    %32 = vector.shape_cast %31 : vector<256x64xf32> to vector<1x256x64xf32>
    %33 = arith.truncf %32 : vector<1x256x64xf32> to vector<1x256x64xbf16>
    %c0_41 = arith.constant 0 : index
    %c0_42 = arith.constant 0 : index
    %c0_43 = arith.constant 0 : index
    %34 = vector.load %arg5[%c0_41, %c0_42, %c0_43] : memref<1x256x64xbf16, #tpu.memory_space<vmem>>, vector<1x256x64xbf16>
    tpu.vector_store %arg5[%c0_41, %c0_42, %c0_43], %33 {strides = array<i32>} : memref<1x256x64xbf16, #tpu.memory_space<vmem>>, vector<1x256x64xbf16>,
    %cst_44 = arith.constant dense<0.000000e+00> : vector<64xf32>
    %35 = vector.multi_reduction <add>, %31, %cst_44 [0] : vector<256x64xf32> to vector<64xf32>
    %36 = vector.shape_cast %35 : vector<64xf32> to vector<1x64xf32>
    %cst_45 = arith.constant 2.560000e+02 : f32
    %37 = vector.broadcast %cst_45 : f32 to vector<1x64xf32>
    %38 = arith.divf %36, %37 : vector<1x64xf32>
    %39 = vector.broadcast %38 : vector<1x64xf32> to vector<256x64xf32>
    %40 = arith.subf %31, %39 : vector<256x64xf32>
    %41 = arith.mulf %40, %40 : vector<256x64xf32>
    %cst_46 = arith.constant dense<0.000000e+00> : vector<64xf32>
    %42 = vector.multi_reduction <add>, %41, %cst_46 [0] : vector<256x64xf32> to vector<64xf32>
    %43 = vector.shape_cast %42 : vector<64xf32> to vector<1x64xf32>
    %44 = tpu.concatenate %38, %43 in 0 : vector<1x64xf32>, vector<1x64xf32> -> vector<2x64xf32>
    %45 = vector.shape_cast %44 : vector<2x64xf32> to vector<1x2x64xf32>
    %c0_47 = arith.constant 0 : index
    %c0_48 = arith.constant 0 : index
    %c0_49 = arith.constant 0 : index
    %46 = vector.load %arg6[%c0_47, %c0_48, %c0_49] : memref<1x2x64xf32, #tpu.memory_space<vmem>>, vector<1x2x64xf32>
    tpu.vector_store %arg6[%c0_47, %c0_48, %c0_49], %45 {strides = array<i32>} : memref<1x2x64xf32, #tpu.memory_space<vmem>>, vector<1x2x64xf32>,
    return
  }
  func.func @transform_0(%arg0: i32) -> (i32, i32, i32) {
    %c0_i32 = arith.constant 0 : i32
    %c0_i32_0 = arith.constant 0 : i32
    %c0_i32_1 = arith.constant 0 : i32
    return %arg0, %c0_i32, %c0_i32_0 : i32, i32, i32
  }
  func.func @transform_1(%arg0: i32) -> (i32, i32, i32) {
    %c0_i32 = arith.constant 0 : i32
    %c0_i32_0 = arith.constant 0 : i32
    %c0_i32_1 = arith.constant 0 : i32
    %c0_i32_2 = arith.constant 0 : i32
    return %c0_i32, %c0_i32_0, %c0_i32_1 : i32, i32, i32
  }
  func.func @transform_2(%arg0: i32) -> (i32, i32) {
    %c0_i32 = arith.constant 0 : i32
    %c0_i32_0 = arith.constant 0 : i32
    %c0_i32_1 = arith.constant 0 : i32
    return %c0_i32, %c0_i32_0 : i32, i32
  }
  func.func @transform_3(%arg0: i32) -> (i32, i32) {
    %c0_i32 = arith.constant 0 : i32
    %c0_i32_0 = arith.constant 0 : i32
    %c0_i32_1 = arith.constant 0 : i32
    return %c0_i32, %c0_i32_0 : i32, i32
  }
  func.func @transform_4(%arg0: i32) -> (i32, i32, i32) {
    %c0_i32 = arith.constant 0 : i32
    %c0_i32_0 = arith.constant 0 : i32
    %c0_i32_1 = arith.constant 0 : i32
    return %arg0, %c0_i32, %c0_i32_0 : i32, i32, i32
  }
  func.func @transform_5(%arg0: i32) -> (i32, i32, i32) {
    %c0_i32 = arith.constant 0 : i32
    %c0_i32_0 = arith.constant 0 : i32
    %c0_i32_1 = arith.constant 0 : i32
    return %arg0, %c0_i32, %c0_i32_0 : i32, i32, i32
  }
}

</mosaic_0001>

<bundles_post_ra>
// kernel: tpu_custom_call.1
= control target key start
LH: loop header
LB: loop body
LE: loop exit
PB: predicated region body
PF: predicated region fallthrough
CT: control target
= control target key end

     0   :  { %11 = vsyncpa [#allocation5], 0  ;;  %s5005_s0 = inlined_call_operand.vmem [shape: f32[2,256,64], index: 0, kind: input, shape index: {}]   ;;  %s5006_s1 = inlined_call_operand.vmem [shape: bf16[3,192,64], index: 1, kind: input, shape index: {}]   ;;  %s5007_s2 = inlined_call_operand.vmem [shape: f32[1,64], index: 2, kind: input, shape index: {}]   ;;  %s5008_s3 = inlined_call_operand.vmem [shape: f32[1,64], index: 3, kind: input, shape index: {}]   ;;  %s5009_s4 = inlined_call_operand.vmem [shape: bf16[2,256,64], index: 4, kind: output, shape index: {0}]   ;;  %s5010_s5 = inlined_call_operand.hbm [shape: f32[2,2,64], index: 5, kind: output, shape index: {1}]  }
   0x1   :  { %13 = vsyncpa [#allocation5 + $0x1], 0  ;;  %s3911_s18 = smov 0   ;;  %s3913_s19 = smov 0  }
   0x2   :  { %s3915_s20 = smov 0   ;;  %s3917_s21 = smov 0  }
   0x3 LB: > { %s3932_s2 = sadd.s32 4294967295, %s3876_s21   ;;  %s3164_s3 = sadd.s32 4294967294, %s3876_s21   ;;  %s3876_s21 = sphi %s3917_s21, %s5018_s21   ;;  %s3872_s20 = sphi %s3915_s20, %s5017_s20   ;;  %s3868_s19 = sphi %s3913_s19, %s5016_s19   ;;  %s3864_s18 = sphi %s3911_s18, %s5015_s18  }
   0x4   : > { %s3936_s22 = sadd.s32 1, %s3876_s21   ;;  %s141_s23 = sadd.s32 1, %s3872_s20 }
   0x5   : > { %s138_s24 = ssub.s32 %s3876_s21, %s3936_s22  ;;  %p151_p0 = scmp.ne.s32.totalorder %s3872_s20, %s3868_s19 }
   0x6   : > { %p139_p1 = scmp.eq.s32.totalorder %s138_s24, 0  ;;  %p152_p2 = scmp.eq.s32.totalorder %s3932_s2, 1 }
   0x7   : > { %p157_p3 = scmp.ne.s32.totalorder %s3868_s19, %s3864_s18  ;;  %p158_p4 = scmp.eq.s32.totalorder %s3164_s3, 1 }
   0x8   : > { %s3947_s25 = scalar_select %p139_p1, %s3872_s20, %s141_s23  }
   0x9   : > { %p3949_p5 = por %p152_p2, %p151_p0  ;;  %p3953_p6 = por %p158_p4, %p157_p3 }
   0xa   : > { %p3167_p7 = scmp.ge.s32.totalorder %s3876_s21, 1  ;;  %p193_p8 = scmp.lt.s32.totalorder %s3876_s21, 3 }
   0xc   : > { %p194_p9 = pnand %p3167_p7, %p193_p8 }
   0xd   : > { %vm647_vm0 = vcmask (!%p194_p9), 519168   ;;  %vm650_vm1 = vcmask (!%p194_p9), 516096   ;;  %v3878_v0 = vmov (!%p194_p9), 0   ;;  %p226_p10 = scmp.lt.s32.totalorder (!%p194_p9), %s3932_s2, 1  ;;  %v3696_v3 = vld [vmem:[%s5006_s1] sm:$0xff] (!%p194_p9)   ;;  %v3697_v4 = vld [vmem:[%s5006_s1 + $0x8] sm:$0xff] (!%p194_p9)  }
   0xe   : > { %197 = sbr.rel (%p194_p9) target bundleno = 686 (0x2ae), region = 36  ;;  %v3173_v1 = vcombine.low (!%p194_p9), %v3878_v0, %v3878_v0  ;;  %v3174_v2 = vcombine.high (!%p194_p9), %v3878_v0, %v3878_v0  ;;  %2158 = vmatprep.subr.bf16.mxu0 (!%p194_p9), %v3878_v0  ;;  %1877 = vmatprep.subr.bf16.mxu1 (!%p194_p9), %v3878_v0  ;;  %v3700_v5 = vld [vmem:[%s5006_s1 + $0x60] sm:$0xff] (!%p194_p9)   ;;  %v3701_v6 = vld [vmem:[%s5006_s1 + $0x10] sm:$0xff] (!%p194_p9)   ;;  %v3702_v7 = vld [vmem:[%s5006_s1 + $0x68] sm:$0xff] (!%p194_p9)   ;;  %vm1064_vm2 = vsmask.f32 (!%p194_p9), 7424 }
   0xf   : > { %2159 = vmatpush1.bf16.msra.mxu0 (!%p194_p9), %v3696_v3  ;;  %1878 = vmatpush1.bf16.msra.mxu1 (!%p194_p9), %v3700_v5  ;;  %vm429_vm3 = vcmask (!%p194_p9), 1040384   ;;  %vm430_vm4 = vsmask.f32 (!%p194_p9), 256  ;;  %v3703_v56 = vld [vmem:[%s5006_s1 + $0x18] sm:$0xff] (!%p194_p9)   ;;  %v3706_v62 = vld [vmem:[%s5006_s1 + $0x70] sm:$0xff] (!%p194_p9)   ;;  %s3879_s29 = smov (!%p194_p9), 64  }
  0x10   : > { %648 = vst.msk [vmem:[#allocation2] sm:$0xf] (!%p194_p9), %vm647_vm0, %v3173_v1  ;;  %649 = vst.msk [vmem:[#allocation2 + $0x4] sm:$0xf] (!%p194_p9), %vm647_vm0, %v3174_v2  ;;  %2160 = vmatprep.subr.bf16.mxu0 (!%p194_p9), %v3878_v0  ;;  %1879 = vmatprep.subr.bf16.mxu1 (!%p194_p9), %v3878_v0  ;;  %vm847_vm6 = vcmask (!%p194_p9), 523264   ;;  %vm1552_vm7 = vcmask (!%p194_p9), 1046528  }
  0x11   : > { %651 = vst.msk [vmem:[#allocation2 + $0x8] sm:$0x1] (!%p194_p9), %vm650_vm1, %v3173_v1  ;;  %702 = vst.msk [vmem:[#allocation2 + $0xd4] sm:$0x1] (!%p194_p9), %vm650_vm1, %v3173_v1  ;;  %vm1335_vm8 = vcmask (!%p194_p9), 1048064   ;;  %vm3056_vm9 = vcmask (!%p194_p9), 517120  }
  0x12   : > { %700 = vst.msk [vmem:[#allocation2 + $0xcc] sm:$0xf] (!%p194_p9), %vm647_vm0, %v3173_v1  ;;  %701 = vst.msk [vmem:[#allocation2 + $0xd0] sm:$0xf] (!%p194_p9), %vm647_vm0, %v3174_v2  ;;  %s3880_s3 = smov (!%p194_p9), [#allocation4]  }
  0x13   : > { %2161 = vmatpush1.bf16.msra.mxu0 (!%p194_p9), %v3697_v4  ;;  %1880 = vmatpush1.bf16.msra.mxu1 (!%p194_p9), %v3702_v7  ;;  %vm4013_vm5 = vmand (!%p194_p9), %vm429_vm3, %vm430_vm4  ;;  %s3818_s23 = sshll.u32 (!%p194_p9), %s3880_s3, 4  ;;  %s3819_s23 = int_to_ptr.vmem [resolvable:$false] %s3818_s23 }
  0x14   : > { %2162 = vmatprep.subr.bf16.mxu0 (!%p194_p9), %v3878_v0  ;;  %1881 = vmatprep.subr.bf16.mxu1 (!%p194_p9), %v3878_v0  ;;  %s3820_s24 = scalar_lea.vmem (!%p194_p9), %s3819_s23, 64 }
  0x15   : > { %s3976_s30 = scalar_select %p226_p10, %s3932_s2, 1 }
  0x17   : > { %s3481_s10 = sshll.u32 %s3976_s30, 8  ;;  %v3676_v20 = vld [vmem:[#allocation2] sm:$0xff]   ;;  %2163 = vmatpush1.bf16.msra.mxu0 %v3701_v6  ;;  %1882 = vmatpush1.bf16.msra.mxu1 %v3706_v62  ;;  %s3482_s7 = sshll.u32 %s3976_s30, 7 }
  0x18   : > { %s3989_s13 = scalar_lea.vmem %s5005_s0, %s3481_s10  ;;  %v3677_v21 = vld [vmem:[#allocation2 + $0x8] ss:$0 sps:$4 sm:$0x11]   ;;  %v1066_v28 = vshrl.u32 %v3676_v20, 16  ;;  %v1068_v29 = vshll.u32 %v3676_v20, 16  ;;  %2164 = vmatprep.subr.bf16.mxu0 %v3878_v0  ;;  %1883 = vmatprep.subr.bf16.mxu1 %v3878_v0  ;;  %s223_s30 = sand.u32 1, %s3868_s19  }
  0x19   : > { %v237_v8 = vld [vmem:[%s3989_s13] sm:$0xff]  ;;  %v238_v9 = vld [vmem:[%s3989_s13 + $0x8] sm:$0xff]  ;;  %v239_v10 = vld [vmem:[%s3989_s13 + $0x10] sm:$0xff]  ;;  %v1073_v30 = vshll.u32 %v3677_v21, 16  ;;  %s3168_s10 = sshll.u32 %s223_s30, 1  ;;  %s3064_s17 = scalar_lea.sflag [#allocation5], %s223_s30 }
  0x1a   : > { %v269_v11 = vpack.c.bf16 %v238_v9, %v237_v8  ;;  %v240_v12 = vld [vmem:[%s3989_s13 + $0x18] sm:$0xff]  ;;  %v241_v13 = vld [vmem:[%s3989_s13 + $0x20] sm:$0xff]  ;;  %v242_v14 = vld [vmem:[%s3989_s13 + $0x28] sm:$0xff]  ;;  %v1070_v37 = vrot.slane %v1068_v29, 1  ;;  %s225_s11 = scalar_lea.vmem [#allocation4], %s3168_s10 }
  0x1b   : > { %v270_v15 = vpack.c.bf16 %v240_v12, %v239_v10  ;;  %v271_v16 = vpack.c.bf16 %v242_v14, %v241_v13  ;;  %v243_v17 = vld [vmem:[%s3989_s13 + $0x30] sm:$0xff]  ;;  %v244_v18 = vld [vmem:[%s3989_s13 + $0x38] sm:$0xff]  ;;  %v1075_v38 = vrot.slane %v1073_v30, 1  ;;  %v245_v41 = vld [vmem:[%s3989_s13 + $0x40] sm:$0xff]  ;;  %2165 = vmatpush1.bf16.msra.mxu0 %v3703_v56  ;;  %s3080_s12 = sshll.u32 %s225_s11, 4  ;;  %s4963_s12 = int_to_ptr.vmem [resolvable:$true] %s3080_s12 }
  0x1c   : > { %v4007_v19 = vpack.c.bf16 %v244_v18, %v243_v17  ;;  %v286_v22 = vshrl.u32 %v269_v11, 16  ;;  %v289_v23 = vshll.u32 %v269_v11, 16  ;;  %v246_v42 = vld [vmem:[%s3989_s13 + $0x48] sm:$0xff]  ;;  %v247_v47 = vld [vmem:[%s3989_s13 + $0x50] sm:$0xff]  ;;  %v248_v48 = vld [vmem:[%s3989_s13 + $0x58] sm:$0xff]  ;;  %v1071_v51 = vor.u32 %v1070_v37, %v1066_v28  ;;  %2166 = vmatprep.subr.bf16.mxu0 %v3878_v0  ;;  %p3821_p0 = scmp.lt.s32.totalorder %s4963_s12, %s3819_s23 }
  0x1d   : > { %v293_v24 = vshrl.u32 %v270_v15, 16  ;;  %v296_v25 = vshll.u32 %v270_v15, 16  ;;  %v300_v26 = vshrl.u32 %v271_v16, 16  ;;  %v303_v27 = vshll.u32 %v271_v16, 16  ;;  %v249_v49 = vld [vmem:[%s3989_s13 + $0x60] sm:$0xff]  ;;  %v250_v50 = vld [vmem:[%s3989_s13 + $0x68] sm:$0xff] }
  0x1e   : > { %v288_v31 = vrot.slane %v286_v22, 7  ;;  %v307_v35 = vshrl.u32 %v4007_v19, 16  ;;  %v310_v36 = vshll.u32 %v4007_v19, 16  ;;  %v251_v55 = vld [vmem:[%s3989_s13 + $0x70] sm:$0xff]  ;;  %v252_v61 = vld [vmem:[%s3989_s13 + $0x78] sm:$0xff]  ;;  %v1076_v63 = vsel %vm1064_vm2, %v1071_v51, %v1075_v38  ;;  %v3707_v8 = vld [vmem:[%s5006_s1 + $0x20] sm:$0xff]  }
  0x1f   : > { %v295_v33 = vrot.slane %v293_v24, 7  ;;  %v302_v34 = vrot.slane %v300_v26, 7  ;;  %1281 = vrot.lane.b32.xlu0 %v1076_v63, %s3879_s29  ;;  %v273_v7 = vpack.c.bf16 %v246_v42, %v245_v41  ;;  %v274_v9 = vpack.c.bf16 %v248_v48, %v247_v47  ;;  %v3708_v12 = vld [vmem:[%s5006_s1 + $0x78] sm:$0xff]   ;;  %v3709_v17 = vld [vmem:[%s5006_s1 + $0x28] sm:$0xff]   ;;  %v253_v22 = vld [vmem:[%s3989_s13 + $0x80] sm:$0xff]  ;;  %2167 = vmatpush1.bf16.msra.mxu0 %v3707_v8 }
  0x20   : > { %v291_v39 = vor.u32 %v289_v23, %v288_v31  ;;  %v448_v40 = vsel %vm4013_vm5, %v288_v31, 0  ;;  %v309_v6 = vrot.slane %v307_v35, 7  ;;  %v4057_v10 = vpack.c.bf16 %v250_v50, %v249_v49  ;;  %v254_v23 = vld [vmem:[%s3989_s13 + $0x88] sm:$0xff]  ;;  %v3712_v24 = vld [vmem:[%s5006_s1 + $0x80] sm:$0xff]   ;;  %v255_v29 = vld [vmem:[%s3989_s13 + $0x90] sm:$0xff]  ;;  %1884 = vmatpush1.bf16.msra.mxu1 %v3708_v12  ;;  %2168 = vmatprep.subr.bf16.mxu0 %v3878_v0 }
  0x21   : > { %v3177_v43 = vcombine.low %v448_v40, %v448_v40  ;;  %v298_v44 = vor.u32 %v296_v25, %v295_v33  ;;  %v449_v45 = vsel %vm4013_vm5, %v295_v33, 0  ;;  %v305_v46 = vor.u32 %v303_v27, %v302_v34  ;;  %v256_v30 = vld [vmem:[%s3989_s13 + $0x98] sm:$0xff]  ;;  %1885 = vmatprep.subr.bf16.mxu1 %v3878_v0  ;;  %v258_v40 = vld [vmem:[%s3989_s13 + $0xa8] sm:$0xff]  ;;  %v3713_v8 = vld [vmem:[%s5006_s1 + $0x30] sm:$0xff]  }
  0x22   : > { %v432_v52 = vsel %vm4013_vm5, 0, %v291_v39  ;;  %v3180_v53 = vcombine.low %v449_v45, %v449_v45  ;;  %v450_v54 = vsel %vm4013_vm5, %v302_v34, 0  ;;  %v4059_v11 = vpack.c.bf16 %v252_v61, %v251_v55  ;;  %v257_v39 = vld [vmem:[%s3989_s13 + $0xa0] sm:$0xff] }
  0x23   : > { %v3175_v57 = vcombine.low %v432_v52, %v432_v52  ;;  %v3176_v58 = vcombine.high %v432_v52, %v432_v52  ;;  %654 = vst.msk [vmem:[#allocation2 + $0x14] sm:$0x1] %vm650_vm1, %v3177_v43  ;;  %v433_v59 = vsel %vm4013_vm5, 0, %v298_v44  ;;  %v434_v60 = vsel %vm4013_vm5, 0, %v305_v46  ;;  %2169 = vmatpush1.bf16.msra.mxu0 %v3709_v17 }
  0x24   : > { %v3178_v1 = vcombine.low %v433_v59, %v433_v59  ;;  %v3179_v2 = vcombine.high %v433_v59, %v433_v59  ;;  %657 = vst.msk [vmem:[#allocation2 + $0x20] sm:$0x1] %vm650_vm1, %v3180_v53  ;;  %v3181_v3 = vcombine.low %v434_v60, %v434_v60  ;;  %v3182_v4 = vcombine.high %v434_v60, %v434_v60 }
  0x25   : > { %652 = vst.msk [vmem:[#allocation2 + $0xc] sm:$0xf] %vm647_vm0, %v3175_v57  ;;  %653 = vst.msk [vmem:[#allocation2 + $0x10] sm:$0xf] %vm647_vm0, %v3176_v58  ;;  %v3183_v5 = vcombine.low %v450_v54, %v450_v54  ;;  %v312_v13 = vor.u32 %v310_v36, %v309_v6  ;;  %v451_v14 = vsel %vm4013_vm5, %v309_v6, 0  ;;  %v314_v15 = vshrl.u32 %v273_v7, 16  ;;  %1886 = vmatpush1.bf16.msra.mxu1 %v3712_v24 }
  0x26   : > { %655 = vst.msk [vmem:[#allocation2 + $0x18] sm:$0xf] %vm647_vm0, %v3178_v1  ;;  %656 = vst.msk [vmem:[#allocation2 + $0x1c] sm:$0xf] %vm647_vm0, %v3179_v2  ;;  %v317_v16 = vshll.u32 %v273_v7, 16  ;;  %v3186_v18 = vcombine.low %v451_v14, %v451_v14  ;;  %v321_v19 = vshrl.u32 %v274_v9, 16  ;;  %v4094_v47 = vpack.c.bf16 %v254_v23, %v253_v22  ;;  %2170 = vmatprep.subr.bf16.mxu0 %v3878_v0 }
  0x27   : > { %658 = vst.msk [vmem:[#allocation2 + $0x24] sm:$0xf] %vm647_vm0, %v3181_v3  ;;  %659 = vst.msk [vmem:[#allocation2 + $0x28] sm:$0xf] %vm647_vm0, %v3182_v4  ;;  %v324_v20 = vshll.u32 %v274_v9, 16  ;;  %v328_v21 = vshrl.u32 %v4057_v10, 16  ;;  %v4098_v52 = vpack.c.bf16 %v256_v30, %v255_v29  ;;  %1887 = vmatprep.subr.bf16.mxu1 %v3878_v0  ;;  %v4103_v61 = vpack.c.bf16 %v258_v40, %v257_v39 }
  0x28   : > { %660 = vst.msk [vmem:[#allocation2 + $0x2c] sm:$0x1] %vm650_vm1, %v3183_v5  ;;  %v435_v25 = vsel %vm4013_vm5, 0, %v312_v13  ;;  %v316_v26 = vrot.slane %v314_v15, 7  ;;  %v331_v27 = vshll.u32 %v4057_v10, 16  ;;  %v335_v28 = vshrl.u32 %v4059_v11, 16  ;;  %2171 = vmatpush1.bf16.msra.mxu0 %v3713_v8 }
  0x29   : > { %v3184_v33 = vcombine.low %v435_v25, %v435_v25  ;;  %v3185_v34 = vcombine.high %v435_v25, %v435_v25  ;;  %663 = vst.msk [vmem:[#allocation2 + $0x38] sm:$0x1] %vm650_vm1, %v3186_v18  ;;  %v323_v35 = vrot.slane %v321_v19, 7  ;;  %v330_v19 = vrot.slane %v328_v21, 7  ;;  %2172 = vmatprep.subr.bf16.mxu0 %v3878_v0  ;;  %v3719_v8 = vld [vmem:[%s5006_s1 + $0x40] sm:$0xff]  }
  0x2a   : > { %v3679_v31 = vld [vmem:[#allocation2 + $0x14] ss:$0 sps:$4 sm:$0x11]   ;;  %v319_v37 = vor.u32 %v317_v16, %v316_v26  ;;  %v452_v38 = vsel %vm4013_vm5, %v316_v26, 0 }
  0x2b   : > { %v3681_v36 = vld [vmem:[#allocation2 + $0x20] ss:$0 sps:$4 sm:$0x11]   ;;  %v1085_v42 = vshll.u32 %v3679_v31, 16  ;;  %661 = vst.msk [vmem:[#allocation2 + $0x30] sm:$0xf] %vm647_vm0, %v3184_v33  ;;  %v3189_v43 = vcombine.low %v452_v38, %v452_v38  ;;  %v326_v46 = vor.u32 %v324_v20, %v323_v35  ;;  %v333_v29 = vor.u32 %v331_v27, %v330_v19 }
  0x2c   : > { %v3678_v41 = vld [vmem:[#allocation2 + $0xc] sm:$0xff]   ;;  %662 = vst.msk [vmem:[#allocation2 + $0x34] sm:$0xf] %vm647_vm0, %v3185_v34  ;;  %v1097_v45 = vshll.u32 %v3681_v36, 16  ;;  %v436_v56 = vsel %vm4013_vm5, 0, %v319_v37  ;;  %v453_v6 = vsel %vm4013_vm5, %v323_v35, 0 }
  0x2d   : > { %v3680_v44 = vld [vmem:[#allocation2 + $0x18] sm:$0xff]   ;;  %v1078_v48 = vshrl.u32 %v3678_v41, 16  ;;  %v1080_v49 = vshll.u32 %v3678_v41, 16  ;;  %v1087_v50 = vrot.slane %v1085_v42, 1  ;;  %666 = vst.msk [vmem:[#allocation2 + $0x44] sm:$0x1] %vm650_vm1, %v3189_v43  ;;  %v3187_v59 = vcombine.low %v436_v56, %v436_v56 }
  0x2e   : > { %v3682_v51 = vld [vmem:[#allocation2 + $0x24] sm:$0xff]   ;;  %v1090_v53 = vshrl.u32 %v3680_v44, 16  ;;  %v1092_v54 = vshll.u32 %v3680_v44, 16  ;;  %v1099_v55 = vrot.slane %v1097_v45, 1  ;;  %v3188_v60 = vcombine.high %v436_v56, %v436_v56 }
  0x2f   : > { %v1082_v57 = vrot.slane %v1080_v49, 1  ;;  %v3683_v58 = vld [vmem:[#allocation2 + $0x2c] ss:$0 sps:$4 sm:$0x11]   ;;  %v1102_v63 = vshrl.u32 %v3682_v51, 16  ;;  %v1104_v1 = vshll.u32 %v3682_v51, 16  ;;  %v3192_v15 = vcombine.low %v453_v6, %v453_v6 }
  0x30   : > { %v1094_v62 = vrot.slane %v1092_v54, 1  ;;  %v437_v2 = vsel %vm4013_vm5, 0, %v326_v46  ;;  %v1109_v4 = vshll.u32 %v3683_v58, 16  ;;  %v3685_v5 = vld [vmem:[#allocation2 + $0x38] ss:$0 sps:$4 sm:$0x11]  }
  0x31   : > { %v1083_v3 = vor.u32 %v1082_v57, %v1078_v48  ;;  %664 = vst.msk [vmem:[#allocation2 + $0x3c] sm:$0xf] %vm647_vm0, %v3187_v59  ;;  %665 = vst.msk [vmem:[#allocation2 + $0x40] sm:$0xf] %vm647_vm0, %v3188_v60  ;;  %v3190_v7 = vcombine.low %v437_v2, %v437_v2  ;;  %v1106_v12 = vrot.slane %v1104_v1, 1  ;;  %v3191_v14 = vcombine.high %v437_v2, %v437_v2  ;;  %v3714_v20 = vld [vmem:[%s5006_s1 + $0x88] sm:$0xff]  }
  0x32   : > { %v1095_v9 = vor.u32 %v1094_v62, %v1090_v53  ;;  %v1111_v17 = vrot.slane %v1109_v4, 1  ;;  %v1121_v18 = vshll.u32 %v3685_v5, 16  ;;  %669 = vst.msk [vmem:[#allocation2 + $0x50] sm:$0x1] %vm650_vm1, %v3192_v15  ;;  %v454_v30 = vsel %vm4013_vm5, %v330_v19, 0  ;;  %1888 = vmatpush1.bf16.msra.mxu1 %v3714_v20  ;;  %v3715_v46 = vld [vmem:[%s5006_s1 + $0x38] sm:$0xff]  }
  0x33   : > { %v3684_v13 = vld [vmem:[#allocation2 + $0x30] sm:$0xff]   ;;  %v1088_v16 = vsel %vm1064_vm2, %v1083_v3, %v1087_v50  ;;  %667 = vst.msk [vmem:[#allocation2 + $0x48] sm:$0xf] %vm647_vm0, %v3190_v7  ;;  %v1107_v23 = vor.u32 %v1106_v12, %v1102_v63  ;;  %668 = vst.msk [vmem:[#allocation2 + $0x4c] sm:$0xf] %vm647_vm0, %v3191_v14  ;;  %v337_v31 = vrot.slane %v335_v28, 7  ;;  %v3195_v35 = vcombine.low %v454_v30, %v454_v30 }
  0x34   : > { %1283 = vrot.lane.b32.xlu0 %v1088_v16, %s3879_s29  ;;  %v1100_v22 = vsel %vm1064_vm2, %v1095_v9, %v1099_v55  ;;  %v1114_v24 = vshrl.u32 %v3684_v13, 16  ;;  %v1116_v25 = vshll.u32 %v3684_v13, 16  ;;  %v1123_v21 = vrot.slane %v1121_v18, 1  ;;  %v3687_v26 = vld [vmem:[#allocation2 + $0x44] ss:$0 sps:$4 sm:$0x11]   ;;  %1889 = vmatprep.subr.bf16.mxu1 %v3878_v0 }
  0x35   : > { %1285 = vrot.lane.b32.xlu1 %v1100_v22, %s3879_s29  ;;  %v1112_v33 = vsel %vm1064_vm2, %v1107_v23, %v1111_v17  ;;  %v338_v36 = vshll.u32 %v4059_v11, 16  ;;  %v1133_v37 = vshll.u32 %v3687_v26, 16  ;;  %v438_v10 = vsel %vm4013_vm5, 0, %v333_v29  ;;  %672 = vst.msk [vmem:[#allocation2 + $0x5c] sm:$0x1] %vm650_vm1, %v3195_v35  ;;  %2173 = vmatpush1.bf16.msra.mxu0 %v3715_v46  ;;  %v3718_v4 = vld [vmem:[%s5006_s1 + $0x90] sm:$0xff]  }
  0x36   : > { %v1118_v34 = vrot.slane %v1116_v25, 1  ;;  %v455_v27 = vsel %vm4013_vm5, %v337_v31, 0  ;;  %v342_v38 = vshrl.u32 %v4094_v47, 16  ;;  %v3193_v40 = vcombine.low %v438_v10, %v438_v10  ;;  %2174 = vmatprep.subr.bf16.mxu0 %v3878_v0  ;;  %v259_v13 = vld [vmem:[%s3989_s13 + $0xb0] sm:$0xff]  ;;  %v260_v14 = vld [vmem:[%s3989_s13 + $0xb8] sm:$0xff]  ;;  %1890 = vmatpush1.bf16.msra.mxu1 %v3718_v4  ;;  %v261_v19 = vld [vmem:[%s3989_s13 + $0xc0] sm:$0xff] }
  0x37   : > { %v3194_v41 = vcombine.high %v438_v10, %v438_v10  ;;  %v340_v42 = vor.u32 %v338_v36, %v337_v31  ;;  %v1135_v11 = vrot.slane %v1133_v37, 1  ;;  %v3198_v43 = vcombine.low %v455_v27, %v455_v27  ;;  %v262_v20 = vld [vmem:[%s3989_s13 + $0xc8] sm:$0xff]  ;;  %1891 = vmatprep.subr.bf16.mxu1 %v3878_v0  ;;  %v3720_v22 = vld [vmem:[%s5006_s1 + $0x98] sm:$0xff]  }
  0x38   : > { %v1119_v39 = vor.u32 %v1118_v34, %v1114_v24  ;;  %v3686_v28 = vld [vmem:[#allocation2 + $0x3c] sm:$0xff]   ;;  %v344_v44 = vrot.slane %v342_v38, 7  ;;  %v345_v45 = vshll.u32 %v4094_v47, 16  ;;  %670 = vst.msk [vmem:[#allocation2 + $0x54] sm:$0xf] %vm647_vm0, %v3193_v40  ;;  %v349_v60 = vshrl.u32 %v4098_v52, 16 }
  0x39   : > { %1287 = vrot.lane.b32.xlu1 %v1112_v33, %s3879_s29  ;;  %v1126_v49 = vshrl.u32 %v3686_v28, 16  ;;  %v1128_v50 = vshll.u32 %v3686_v28, 16  ;;  %671 = vst.msk [vmem:[#allocation2 + $0x58] sm:$0xf] %vm647_vm0, %v3194_v41  ;;  %v439_v51 = vsel %vm4013_vm5, 0, %v340_v42  ;;  %v352_v62 = vshll.u32 %v4098_v52, 16  ;;  %2175 = vmatpush1.bf16.msra.mxu0 %v3719_v8 }
  0x3a   : > { %v1124_v48 = vsel %vm1064_vm2, %v1119_v39, %v1123_v21  ;;  %v3688_v53 = vld [vmem:[#allocation2 + $0x48] sm:$0xff]   ;;  %v3196_v54 = vcombine.low %v439_v51, %v439_v51  ;;  %v3197_v47 = vcombine.high %v439_v51, %v439_v51  ;;  %675 = vst.msk [vmem:[#allocation2 + $0x68] sm:$0x1] %vm650_vm1, %v3198_v43  ;;  %v347_v55 = vor.u32 %v345_v45, %v344_v44  ;;  %v3689_v58 = vld [vmem:[#allocation2 + $0x50] ss:$0 sps:$4 sm:$0x11]  }
  0x3b   : > { %1289 = vrot.lane.b32.xlu0 %v1124_v48, %s3879_s29  ;;  %v456_v56 = vsel %vm4013_vm5, %v344_v44, 0  ;;  %v1130_v57 = vrot.slane %v1128_v50, 1  ;;  %v1138_v63 = vshrl.u32 %v3688_v53, 16  ;;  %v1140_v1 = vshll.u32 %v3688_v53, 16  ;;  %2176 = vmatprep.subr.bf16.mxu0 %v3878_v0  ;;  %v3721_v35 = vld [vmem:[%s5006_s1 + $0x48] sm:$0xff]   ;;  %v3725_v8 = vld [vmem:[%s5006_s1 + $0xa0] sm:$0xff]  }
  0x3c   : > { %v3201_v59 = vcombine.low %v456_v56, %v456_v56  ;;  %673 = vst.msk [vmem:[#allocation2 + $0x60] sm:$0xf] %vm647_vm0, %v3196_v54  ;;  %674 = vst.msk [vmem:[#allocation2 + $0x64] sm:$0xf] %vm647_vm0, %v3197_v47  ;;  %v440_v2 = vsel %vm4013_vm5, 0, %v347_v55  ;;  %v356_v3 = vshrl.u32 %v4103_v61, 16  ;;  %1892 = vmatpush1.bf16.msra.mxu1 %v3720_v22  ;;  %v280_v27 = vpack.c.bf16 %v260_v14, %v259_v13 }
  0x3d   : > { %v1131_v52 = vor.u32 %v1130_v57, %v1126_v49  ;;  %v1145_v5 = vshll.u32 %v3689_v58, 16  ;;  %v3199_v6 = vcombine.low %v440_v2, %v440_v2  ;;  %v3200_v7 = vcombine.high %v440_v2, %v440_v2  ;;  %v3691_v12 = vld [vmem:[#allocation2 + $0x5c] ss:$0 sps:$4 sm:$0x11]   ;;  %1893 = vmatprep.subr.bf16.mxu1 %v3878_v0  ;;  %2177 = vmatpush1.bf16.msra.mxu0 %v3721_v35  ;;  %v263_v57 = vld [vmem:[%s3989_s13 + $0xd0] sm:$0xff]  ;;  %v3727_v22 = vld [vmem:[%s5006_s1 + $0xa8] sm:$0xff]  }
  0x3e   : > { %678 = vst.msk [vmem:[#allocation2 + $0x74] sm:$0x1] %vm650_vm1, %v3201_v59  ;;  %v1142_v9 = vrot.slane %v1140_v1, 1  ;;  %v351_v17 = vrot.slane %v349_v60, 7  ;;  %v358_v18 = vrot.slane %v356_v3, 7  ;;  %v1157_v25 = vshll.u32 %v3691_v12, 16  ;;  %2178 = vmatprep.subr.bf16.mxu0 %v3878_v0 }
  0x3f   : > { %v1136_v15 = vsel %vm1064_vm2, %v1131_v52, %v1135_v11  ;;  %v1147_v16 = vrot.slane %v1145_v5, 1  ;;  %676 = vst.msk [vmem:[#allocation2 + $0x6c] sm:$0xf] %vm647_vm0, %v3199_v6  ;;  %677 = vst.msk [vmem:[#allocation2 + $0x70] sm:$0xf] %vm647_vm0, %v3200_v7  ;;  %v4192_v28 = vpack.c.bf16 %v262_v20, %v261_v19  ;;  %v359_v50 = vshll.u32 %v4103_v61, 16 }
  0x40   : > { %1291 = vrot.lane.b32.xlu1 %v1136_v15, %s3879_s29  ;;  %v1143_v23 = vor.u32 %v1142_v9, %v1138_v63  ;;  %v3690_v24 = vld [vmem:[#allocation2 + $0x54] sm:$0xff]   ;;  %v354_v26 = vor.u32 %v352_v62, %v351_v17  ;;  %v457_v29 = vsel %vm4013_vm5, %v351_v17, 0  ;;  %v1159_v34 = vrot.slane %v1157_v25, 1  ;;  %v3724_v7 = vld [vmem:[#allocation2] sm:$0xff]   ;;  %1894 = vmatpush1.bf16.msra.mxu1 %v3725_v8 }
  0x41   : > { %v3693_v21 = vld [vmem:[#allocation2 + $0x68] ss:$0 sps:$4 sm:$0x11]   ;;  %v1150_v31 = vshrl.u32 %v3690_v24, 16  ;;  %v1152_v33 = vshll.u32 %v3690_v24, 16  ;;  %v3204_v10 = vcombine.low %v457_v29, %v457_v29  ;;  %v458_v51 = vsel %vm4013_vm5, %v358_v18, 0  ;;  %1895 = vmatprep.subr.bf16.mxu1 %v3878_v0 }
  0x42   : > { %v1148_v30 = vsel %vm1064_vm2, %v1143_v23, %v1147_v16  ;;  %v1169_v37 = vshll.u32 %v3693_v21, 16  ;;  %v441_v11 = vsel %vm4013_vm5, 0, %v354_v26  ;;  %v363_v53 = vshrl.u32 %v280_v27, 16  ;;  %v264_v62 = vld [vmem:[%s3989_s13 + $0xd8] sm:$0xff]  ;;  %v3726_v16 = vld [vmem:[%s5006_s1 + $0x50] sm:$0xff]   ;;  %848 = vst.msk [vmem:[#allocation3] sm:$0xff] %vm847_vm6, %v3724_v7 }
  0x43   : > { %1293 = vrot.lane.b32.xlu0 %v1148_v30, %s3879_s29  ;;  %v3692_v36 = vld [vmem:[#allocation2 + $0x60] sm:$0xff]   ;;  %v1154_v38 = vrot.slane %v1152_v33, 1  ;;  %681 = vst.msk [vmem:[#allocation2 + $0x80] sm:$0x1] %vm650_vm1, %v3204_v10  ;;  %v3202_v46 = vcombine.low %v441_v11, %v441_v11  ;;  %v3203_v48 = vcombine.high %v441_v11, %v441_v11  ;;  %v361_v59 = vor.u32 %v359_v50, %v358_v18  ;;  %v3728_v10 = vld [vmem:[%s5006_s1 + $0x58] sm:$0xff]  }
  0x44   : > { %v1162_v40 = vshrl.u32 %v3692_v36, 16  ;;  %v1164_v41 = vshll.u32 %v3692_v36, 16  ;;  %v1171_v42 = vrot.slane %v1169_v37, 1  ;;  %v3207_v60 = vcombine.low %v458_v51, %v458_v51  ;;  %2179 = vmatpush1.bf16.msra.mxu0 %v3726_v16  ;;  %1896 = vmatpush1.bf16.msra.mxu1 %v3727_v22  ;;  %v3732_v16 = vld [vmem:[#allocation2 + $0x8] ss:$0 sps:$4 sm:$0x11]  }
  0x45   : > { %v3695_v39 = vld [vmem:[#allocation2 + $0x74] ss:$0 sps:$4 sm:$0x11]   ;;  %v1155_v43 = vor.u32 %v1154_v38, %v1150_v31  ;;  %679 = vst.msk [vmem:[#allocation2 + $0x78] sm:$0xf] %vm647_vm0, %v3202_v46  ;;  %v365_v61 = vrot.slane %v363_v53, 7  ;;  %v282_v6 = vpack.c.bf16 %v264_v62, %v263_v57  ;;  %2180 = vmatprep.subr.bf16.mxu0 %v3878_v0  ;;  %1897 = vmatprep.subr.bf16.mxu1 %v3878_v0 }
  0x46   : > { %v3694_v44 = vld [vmem:[#allocation2 + $0x6c] sm:$0xff]   ;;  %v1181_v45 = vshll.u32 %v3695_v39, 16  ;;  %v1166_v49 = vrot.slane %v1164_v41, 1  ;;  %680 = vst.msk [vmem:[#allocation2 + $0x7c] sm:$0xf] %vm647_vm0, %v3203_v48  ;;  %v366_v1 = vshll.u32 %v280_v27, 16 }
  0x47   : > { %v1160_v54 = vsel %vm1064_vm2, %v1155_v43, %v1159_v34  ;;  %v1174_v47 = vshrl.u32 %v3694_v44, 16  ;;  %v1176_v55 = vshll.u32 %v3694_v44, 16  ;;  %v370_v2 = vshrl.u32 %v4192_v28, 16  ;;  %684 = vst.msk [vmem:[#allocation2 + $0x8c] sm:$0x1] %vm650_vm1, %v3207_v60  ;;  %v265_v43 = vld [vmem:[%s3989_s13 + $0xe0] sm:$0xff] }
  0x48   : > { %v1183_v56 = vrot.slane %v1181_v45, 1  ;;  %1295 = vrot.lane.b32.xlu1 %v1160_v54, %s3879_s29  ;;  %v1167_v58 = vor.u32 %v1166_v49, %v1162_v40  ;;  %v373_v3 = vshll.u32 %v4192_v28, 16  ;;  %v442_v52 = vsel %vm4013_vm5, 0, %v361_v59  ;;  %2181 = vmatpush1.bf16.msra.mxu0 %v3728_v10  ;;  %v266_v44 = vld [vmem:[%s3989_s13 + $0xe8] sm:$0xff]  ;;  %v267_v10 = vld [vmem:[%s3989_s13 + $0xf0] sm:$0xff] }
  0x49   : > { %v1178_v63 = vrot.slane %v1176_v55, 1  ;;  %v459_v5 = vsel %vm4013_vm5, %v365_v61, 0  ;;  %v3205_v13 = vcombine.low %v442_v52, %v442_v52  ;;  %v3206_v14 = vcombine.high %v442_v52, %v442_v52  ;;  %2497 = vmatprep.subr.bf16.mxu0 %v3878_v0  ;;  %v3733_v59 = vld [vmem:[#allocation2 + $0xc] sm:$0xff]   ;;  %v3731_v52 = vld [vmem:[#allocation2] sm:$0xfe]  }
  0x4a   : > { %v1172_v4 = vsel %vm1064_vm2, %v1167_v58, %v1171_v42  ;;  %v3699_v12 = vld [vmem:[#allocation2 + $0x80] ss:$0 sps:$4 sm:$0x11]   ;;  %v368_v15 = vor.u32 %v366_v1, %v365_v61  ;;  %v3210_v17 = vcombine.low %v459_v5, %v459_v5  ;;  %v372_v18 = vrot.slane %v370_v2, 7  ;;  %849 = vst.msk [vmem:[#allocation3 + $0x10] sm:$0xff] %vm847_vm6, %v3733_v59 }
  0x4b   : > { %1297 = vrot.lane.b32.xlu0 %v1172_v4, %s3879_s29  ;;  %v1179_v9 = vor.u32 %v1178_v63, %v1174_v47  ;;  %v377_v19 = vshrl.u32 %v282_v6, 16  ;;  %v380_v20 = vshll.u32 %v282_v6, 16  ;;  %v1193_v24 = vshll.u32 %v3699_v12, 16  ;;  %682 = vst.msk [vmem:[#allocation2 + $0x84] sm:$0xf] %vm647_vm0, %v3205_v13 }
  0x4c   : > { %683 = vst.msk [vmem:[#allocation2 + $0x88] sm:$0xf] %vm647_vm0, %v3206_v14  ;;  %v443_v25 = vsel %vm4013_vm5, 0, %v368_v15  ;;  %v375_v30 = vor.u32 %v373_v3, %v372_v18  ;;  %v460_v31 = vsel %vm4013_vm5, %v372_v18, 0  ;;  %v283_v48 = vpack.c.bf16 %v266_v44, %v265_v43  ;;  %v3738_v43 = vld [vmem:[#allocation2 + $0x18] sm:$0xff]  }
  0x4d   : > { %v1184_v23 = vsel %vm1064_vm2, %v1179_v9, %v1183_v56  ;;  %v3698_v21 = vld [vmem:[#allocation2 + $0x78] sm:$0xff]   ;;  %v3208_v26 = vcombine.low %v443_v25, %v443_v25  ;;  %v3209_v29 = vcombine.high %v443_v25, %v443_v25  ;;  %687 = vst.msk [vmem:[#allocation2 + $0x98] sm:$0x1] %vm650_vm1, %v3210_v17  ;;  %v3213_v33 = vcombine.low %v460_v31, %v460_v31  ;;  %v3739_v44 = vld [vmem:[#allocation2 + $0xc] sm:$0xfe]  }
  0x4e   : > { %1299 = vrot.lane.b32.xlu1 %v1184_v23, %s3879_s29  ;;  %v379_v34 = vrot.slane %v377_v19, 7  ;;  %v1186_v35 = vshrl.u32 %v3698_v21, 16  ;;  %v1188_v36 = vshll.u32 %v3698_v21, 16  ;;  %v444_v37 = vsel %vm4013_vm5, 0, %v375_v30  ;;  %v3734_v30 = vld [vmem:[%s5006_s1 + $0xb0] sm:$0xff]   ;;  %850 = vst.msk [vmem:[#allocation3 + $0x20] sm:$0xff] %vm847_vm6, %v3738_v43 }
  0x4f   : > { %685 = vst.msk [vmem:[#allocation2 + $0x90] sm:$0xf] %vm647_vm0, %v3208_v26  ;;  %686 = vst.msk [vmem:[#allocation2 + $0x94] sm:$0xf] %vm647_vm0, %v3209_v29  ;;  %v3211_v38 = vcombine.low %v444_v37, %v444_v37  ;;  %v3212_v39 = vcombine.high %v444_v37, %v444_v37  ;;  %v1195_v42 = vrot.slane %v1193_v24, 1  ;;  %v384_v58 = vshrl.u32 %v283_v48, 16  ;;  %1898 = vmatpush1.bf16.msra.mxu1 %v3734_v30 }
  0x50   : > { %v3705_v27 = vld [vmem:[#allocation2 + $0x8c] ss:$0 sps:$4 sm:$0x11]   ;;  %690 = vst.msk [vmem:[#allocation2 + $0xa4] sm:$0x1] %vm650_vm1, %v3213_v33  ;;  %v382_v28 = vor.u32 %v380_v20, %v379_v34  ;;  %v461_v40 = vsel %vm4013_vm5, %v379_v34, 0  ;;  %1899 = vmatprep.subr.bf16.mxu1 %v3878_v0 }
  0x51   : > { %v1190_v41 = vrot.slane %v1188_v36, 1  ;;  %v3216_v11 = vcombine.low %v461_v40, %v461_v40  ;;  %v1205_v45 = vshll.u32 %v3705_v27, 16  ;;  %688 = vst.msk [vmem:[#allocation2 + $0x9c] sm:$0xf] %vm647_vm0, %v3211_v38  ;;  %689 = vst.msk [vmem:[#allocation2 + $0xa0] sm:$0xf] %vm647_vm0, %v3212_v39 }
  0x52   : > { %v445_v46 = vsel %vm4013_vm5, 0, %v382_v28  ;;  %v386_v4 = vrot.slane %v384_v58, 7  ;;  %v387_v22 = vshll.u32 %v283_v48, 16  ;;  %v1553_v24 = vrot.slane %v3731_v52, 1  ;;  %v3735_v36 = vld [vmem:[%s5006_s1 + $0xb8] sm:$0xff]  }
  0x53   : > { %v1191_v49 = vor.u32 %v1190_v41, %v1186_v35  ;;  %v3704_v50 = vld [vmem:[#allocation2 + $0x84] sm:$0xff]   ;;  %v3214_v51 = vcombine.low %v445_v46, %v445_v46  ;;  %v3215_v53 = vcombine.high %v445_v46, %v445_v46  ;;  %693 = vst.msk [vmem:[#allocation2 + $0xb0] sm:$0x1] %vm650_vm1, %v3216_v11  ;;  %v1207_v54 = vrot.slane %v1205_v45, 1  ;;  %v268_v28 = vld [vmem:[%s3989_s13 + $0xf8] sm:$0xff]  ;;  %1900 = vmatpush1.bf16.msra.mxu1 %v3735_v36  ;;  %s4593_s13 = scalar_lea.vmem %s5009_s4, %s3482_s7 }
  0x54   : > { %v3711_v47 = vld [vmem:[#allocation2 + $0x98] ss:$0 sps:$4 sm:$0x11]   ;;  %v1198_v56 = vshrl.u32 %v3704_v50, 16  ;;  %v1200_v57 = vshll.u32 %v3704_v50, 16  ;;  %v462_v23 = vsel %vm4013_vm5, %v386_v4, 0  ;;  %v389_v33 = vor.u32 %v387_v22, %v386_v4  ;;  %3515 = vmatprep.subr.bf16.mxu1 %v3878_v0 }
  0x55   : > { %v1196_v55 = vsel %vm1064_vm2, %v1191_v49, %v1195_v42  ;;  %691 = vst.msk [vmem:[#allocation2 + $0xa8] sm:$0xf] %vm647_vm0, %v3214_v51  ;;  %692 = vst.msk [vmem:[#allocation2 + $0xac] sm:$0xf] %vm647_vm0, %v3215_v53  ;;  %v1217_v61 = vshll.u32 %v3711_v47, 16  ;;  %v3219_v34 = vcombine.low %v462_v23, %v462_v23  ;;  %v1554_v35 = vrot.slane %v3732_v16, 1 }
  0x56   : > { %1301 = vrot.lane.b32.xlu0 %v1196_v55, %s3879_s29  ;;  %v3710_v60 = vld [vmem:[#allocation2 + $0x90] sm:$0xff]   ;;  %v1202_v62 = vrot.slane %v1200_v57, 1  ;;  %v446_v38 = vsel %vm4013_vm5, 0, %v389_v33  ;;  %v284_v11 = vpack.c.bf16 %v268_v28, %v267_v10  ;;  %v1556_v50 = vrot.slane %v3739_v44, 1  ;;  %v3756_v33 = vld [vmem:[#allocation2 + $0x48] sm:$0xff]   ;;  %v3766_v44 = vld [vmem:[#allocation2 + $0x60] sm:$0xff]  }
  0x57   : > { %v3717_v63 = vld [vmem:[#allocation2 + $0xa4] ss:$0 sps:$4 sm:$0x11]   ;;  %v1210_v1 = vshrl.u32 %v3710_v60, 16  ;;  %v1212_v2 = vshll.u32 %v3710_v60, 16  ;;  %v1219_v3 = vrot.slane %v1217_v61, 1  ;;  %v1555_v39 = vsel %vm1552_vm7, %v1553_v24, %v1554_v35 }
  0x58   : > { %v1203_v5 = vor.u32 %v1202_v62, %v1198_v56  ;;  %v3716_v6 = vld [vmem:[#allocation2 + $0x9c] sm:$0xff]   ;;  %v1229_v7 = vshll.u32 %v3717_v63, 16  ;;  %696 = vst.msk [vmem:[#allocation2 + $0xbc] sm:$0x1] %vm650_vm1, %v3219_v34  ;;  %v3217_v41 = vcombine.low %v446_v38, %v446_v38  ;;  %v3218_v42 = vcombine.high %v446_v38, %v446_v38 }
  0x59   : > { %v1214_v8 = vrot.slane %v1212_v2, 1  ;;  %v1222_v13 = vshrl.u32 %v3716_v6, 16  ;;  %v1224_v14 = vshll.u32 %v3716_v6, 16  ;;  %1625 = vst.msk [vmem:[#allocation3 + $0x8] sm:$0xff] %vm847_vm6, %v1555_v39  ;;  %v391_v46 = vshrl.u32 %v284_v11, 16  ;;  %v3752_v24 = vld [vmem:[#allocation2 + $0x3c] sm:$0xff]  }
  0x5a   : > { %v3723_v9 = vld [vmem:[#allocation2 + $0xb0] ss:$0 sps:$4 sm:$0x11]   ;;  %v1208_v12 = vsel %vm1064_vm2, %v1203_v5, %v1207_v54  ;;  %v1231_v15 = vrot.slane %v1229_v7, 1  ;;  %694 = vst.msk [vmem:[#allocation2 + $0xb4] sm:$0xf] %vm647_vm0, %v3217_v41 }
  0x5b   : > { %1303 = vrot.lane.b32.xlu1 %v1208_v12, %s3879_s29  ;;  %v1215_v17 = vor.u32 %v1214_v8, %v1210_v1  ;;  %v1241_v19 = vshll.u32 %v3723_v9, 16  ;;  %v1226_v20 = vrot.slane %v1224_v14, 1  ;;  %695 = vst.msk [vmem:[#allocation2 + $0xb8] sm:$0xf] %vm647_vm0, %v3218_v42  ;;  %v394_v48 = vshll.u32 %v284_v11, 16  ;;  %v3743_v54 = vld [vmem:[#allocation2 + $0x24] sm:$0xff]  }
  0x5c   : > { %v3722_v18 = vld [vmem:[#allocation2 + $0xa8] sm:$0xff]   ;;  %v3740_v49 = vld [vmem:[#allocation2 + $0x14] ss:$0 sps:$4 sm:$0x11]   ;;  %v393_v51 = vrot.slane %v391_v46, 7  ;;  %851 = vst.msk [vmem:[#allocation3 + $0x30] sm:$0xff] %vm847_vm6, %v3743_v54 }
  0x5d   : > { %v1220_v25 = vsel %vm1064_vm2, %v1215_v17, %v1219_v3  ;;  %v1234_v21 = vshrl.u32 %v3722_v18, 16  ;;  %v1236_v26 = vshll.u32 %v3722_v18, 16  ;;  %v1243_v29 = vrot.slane %v1241_v19, 1  ;;  %v3744_v61 = vld [vmem:[#allocation2 + $0x18] sm:$0xfe]   ;;  %v3747_v7 = vld [vmem:[#allocation2 + $0x30] sm:$0xff]  }
  0x5e   : > { %1305 = vrot.lane.b32.xlu0 %v1220_v25, %s3879_s29  ;;  %v1227_v31 = vor.u32 %v1226_v20, %v1222_v13  ;;  %v1557_v53 = vrot.slane %v3740_v49, 1  ;;  %v396_v55 = vor.u32 %v394_v48, %v393_v51  ;;  %v463_v56 = vsel %vm4013_vm5, %v393_v51, 0  ;;  %v3745_v3 = vld [vmem:[#allocation2 + $0x20] ss:$0 sps:$4 sm:$0x11]   ;;  %852 = vst.msk [vmem:[#allocation3 + $0x40] sm:$0xff] %vm847_vm6, %v3747_v7 }
  0x5f   : > { %v1238_v37 = vrot.slane %v1236_v26, 1  ;;  %v3730_v47 = vld [vmem:[#allocation2 + $0xbc] ss:$0 sps:$4 sm:$0x11]   ;;  %v3222_v59 = vcombine.low %v463_v56, %v463_v56  ;;  %v1559_v4 = vrot.slane %v3744_v61, 1  ;;  %v1560_v6 = vrot.slane %v3745_v3, 1 }
  0x60   : > { %v1232_v27 = vsel %vm1064_vm2, %v1227_v31, %v1231_v15  ;;  %v1558_v57 = vsel %vm1552_vm7, %v1556_v50, %v1557_v53  ;;  %v1644_v58 = vld [vmem:[#allocation3 + $0x8] sm:$0xff]  ;;  %v447_v60 = vsel %vm4013_vm5, 0, %v396_v55  ;;  %v1253_v63 = vshll.u32 %v3730_v47, 16  ;;  %v3749_v14 = vld [vmem:[#allocation2 + $0x2c] ss:$0 sps:$4 sm:$0x11]  }
  0x61   : > { %1307 = vrot.lane.b32.xlu1 %v1232_v27, %s3879_s29  ;;  %v1239_v40 = vor.u32 %v1238_v37, %v1234_v21  ;;  %1626 = vst.msk [vmem:[#allocation3 + $0x18] sm:$0xff] %vm847_vm6, %v1558_v57  ;;  %3377 = vmatprep.mubr.msk.bf16.mxu0 %vm847_vm6, %v1644_v58  ;;  %v3220_v1 = vcombine.low %v447_v60, %v447_v60  ;;  %v3748_v13 = vld [vmem:[#allocation2 + $0x24] sm:$0xfe]   ;;  %v1563_v19 = vrot.slane %v3749_v14, 1  ;;  %853 = vst.msk [vmem:[#allocation3 + $0x50] sm:$0xff] %vm847_vm6, %v3752_v24  ;;  %v3761_v39 = vld [vmem:[#allocation2 + $0x54] sm:$0xff]  }
  0x62   : > { %v3729_v62 = vld [vmem:[#allocation2 + $0xb4] sm:$0xff]   ;;  %v3221_v2 = vcombine.high %v447_v60, %v447_v60  ;;  %699 = vst.msk [vmem:[#allocation2 + $0xc8] sm:$0x1] %vm650_vm1, %v3222_v59  ;;  %v1255_v32 = vrot.slane %v1253_v63, 1  ;;  %v1561_v12 = vsel %vm1552_vm7, %v1559_v4, %v1560_v6  ;;  %v1562_v17 = vrot.slane %v3748_v13, 1  ;;  %v3771_v51 = vld [vmem:[#allocation2 + $0x6c] sm:$0xff]  }
  0x63   : > { %v1244_v45 = vsel %vm1064_vm2, %v1239_v40, %v1243_v29  ;;  %v1246_v52 = vshrl.u32 %v3729_v62, 16  ;;  %v1248_v5 = vshll.u32 %v3729_v62, 16  ;;  %697 = vst.msk [vmem:[#allocation2 + $0xc0] sm:$0xf] %vm647_vm0, %v3220_v1  ;;  %v3753_v26 = vld [vmem:[#allocation2 + $0x30] sm:$0xfe]  }
  0x64   : > { %1309 = vrot.lane.b32.xlu0 %v1244_v45, %s3879_s29  ;;  %698 = vst.msk [vmem:[#allocation2 + $0xc4] sm:$0xf] %vm647_vm0, %v3221_v2  ;;  %v1564_v23 = vsel %vm1552_vm7, %v1562_v17, %v1563_v19  ;;  %v3754_v31 = vld [vmem:[#allocation2 + $0x38] ss:$0 sps:$4 sm:$0x11]   ;;  %v1565_v34 = vrot.slane %v3753_v26, 1 }
  0x65   : > { %v1250_v8 = vrot.slane %v1248_v5, 1  ;;  %1627 = vst.msk [vmem:[#allocation3 + $0x28] sm:$0xff] %vm847_vm6, %v1561_v12  ;;  %1628 = vst.msk [vmem:[#allocation3 + $0x38] sm:$0xff] %vm847_vm6, %v1564_v23  ;;  %v1566_v36 = vrot.slane %v3754_v31, 1  ;;  %v3757_v37 = vld [vmem:[#allocation2 + $0x3c] sm:$0xfe]  }
  0x66   : > { %854 = vst.msk [vmem:[#allocation3 + $0x60] sm:$0xff] %vm847_vm6, %v3756_v33  ;;  %v3758_v38 = vld [vmem:[#allocation2 + $0x44] ss:$0 sps:$4 sm:$0x11]   ;;  %v1568_v28 = vrot.slane %v3757_v37, 1  ;;  %855 = vst.msk [vmem:[#allocation3 + $0x70] sm:$0xff] %vm847_vm6, %v3761_v39 }
  0x67   : > { %v1251_v15 = vor.u32 %v1250_v8, %v1246_v52  ;;  %v1567_v27 = vsel %vm1552_vm7, %v1565_v34, %v1566_v36  ;;  %v1569_v40 = vrot.slane %v3758_v38, 1  ;;  %v3762_v42 = vld [vmem:[#allocation2 + $0x48] sm:$0xfe]   ;;  %v3763_v11 = vld [vmem:[#allocation2 + $0x50] ss:$0 sps:$4 sm:$0x11]  }
  0x68   : > { %v4300_v9 = vld [vmem:[#allocation3 + $0x18] sm:$0xff]  ;;  %1629 = vst.msk [vmem:[#allocation3 + $0x48] sm:$0xff] %vm847_vm6, %v1567_v27  ;;  %v1571_v43 = vrot.slane %v3762_v42, 1  ;;  %v1572_v45 = vrot.slane %v3763_v11, 1  ;;  %856 = vst.msk [vmem:[#allocation3 + $0x80] sm:$0xff] %vm847_vm6, %v3766_v44  ;;  %v3776_v1 = vld [vmem:[#allocation2 + $0x78] sm:$0xff]  }
  0x69   : > { %3349 = vmatprep.mubr.msk.bf16.mxu1 %vm847_vm6, %v4300_v9  ;;  %v3737_v16 = vld [vmem:[#allocation2 + $0xc8] ss:$0 sps:$4 sm:$0x11]   ;;  %v1256_v18 = vsel %vm1064_vm2, %v1251_v15, %v1255_v32  ;;  %v1570_v41 = vsel %vm1552_vm7, %v1568_v28, %v1569_v40  ;;  %v3767_v48 = vld [vmem:[#allocation2 + $0x54] sm:$0xfe]   ;;  %857 = vst.msk [vmem:[#allocation3 + $0x90] sm:$0xff] %vm847_vm6, %v3771_v51 }
  0x6a   : > { %1311 = vrot.lane.b32.xlu1 %v1256_v18, %s3879_s29  ;;  %v1265_v22 = vshll.u32 %v3737_v16, 16  ;;  %1630 = vst.msk [vmem:[#allocation3 + $0x58] sm:$0xff] %vm847_vm6, %v1570_v41  ;;  %v1573_v46 = vsel %vm1552_vm7, %v1571_v43, %v1572_v45  ;;  %v3768_v49 = vld [vmem:[#allocation2 + $0x5c] ss:$0 sps:$4 sm:$0x11]   ;;  %v1574_v50 = vrot.slane %v3767_v48, 1 }
  0x6b   : > { %v3736_v20 = vld [vmem:[#allocation2 + $0xc0] sm:$0xff]   ;;  %1631 = vst.msk [vmem:[#allocation3 + $0x68] sm:$0xff] %vm847_vm6, %v1573_v46  ;;  %v1575_v53 = vrot.slane %v3768_v49, 1  ;;  %v3773_v55 = vld [vmem:[#allocation2 + $0x68] ss:$0 sps:$4 sm:$0x11]  }
  0x6c   : > { %v1258_v25 = vshrl.u32 %v3736_v20, 16  ;;  %v1260_v21 = vshll.u32 %v3736_v20, 16  ;;  %v1267_v30 = vrot.slane %v1265_v22, 1  ;;  %v3772_v47 = vld [vmem:[#allocation2 + $0x60] sm:$0xfe]   ;;  %v3774_v56 = vld [vmem:[#allocation2 + $0xcc] sm:$0xff]  }
  0x6d   : > { %v1576_v54 = vsel %vm1552_vm7, %v1574_v50, %v1575_v53  ;;  %v1577_v57 = vrot.slane %v3772_v47, 1  ;;  %v1578_v58 = vrot.slane %v3773_v55, 1  ;;  %v3775_v59 = vld [vmem:[#allocation2 + $0xd4] ss:$0 sps:$4 sm:$0x11]   ;;  %v1270_v60 = vshrl.u32 %v3774_v56, 16 }
  0x6e   : > { %v1262_v29 = vrot.slane %v1260_v21, 1  ;;  %1632 = vst.msk [vmem:[#allocation3 + $0x78] sm:$0xff] %vm847_vm6, %v1576_v54  ;;  %v1272_v61 = vshll.u32 %v3774_v56, 16  ;;  %v1277_v63 = vshll.u32 %v3775_v59, 16  ;;  %v3777_v3 = vld [vmem:[#allocation2 + $0x6c] sm:$0xfe]  }
  0x6f   : > { %v1579_v62 = vsel %vm1552_vm7, %v1577_v57, %v1578_v58  ;;  %v3779_v4 = vld [vmem:[#allocation2 + $0x84] sm:$0xff]   ;;  %858 = vst.msk [vmem:[#allocation3 + $0xa0] sm:$0xff] %vm847_vm6, %v3776_v1  ;;  %v3778_v5 = vld [vmem:[#allocation2 + $0x74] ss:$0 sps:$4 sm:$0x11]   ;;  %v1580_v7 = vrot.slane %v3777_v3, 1 }
  0x70   : > { %v1263_v35 = vor.u32 %v1262_v29, %v1258_v25  ;;  %1633 = vst.msk [vmem:[#allocation3 + $0x88] sm:$0xff] %vm847_vm6, %v1579_v62  ;;  %v1274_v2 = vrot.slane %v1272_v61, 1  ;;  %v1279_v52 = vrot.slane %v1277_v63, 1  ;;  %859 = vst.msk [vmem:[#allocation3 + $0xb0] sm:$0xff] %vm847_vm6, %v3779_v4  ;;  %v3782_v8 = vld [vmem:[#allocation2 + $0x90] sm:$0xff]   ;;  %v1581_v32 = vrot.slane %v3778_v5, 1 }
  0x71   : > { %v3780_v14 = vld [vmem:[#allocation2 + $0x78] sm:$0xfe]   ;;  %v3781_v15 = vld [vmem:[#allocation2 + $0x80] ss:$0 sps:$4 sm:$0x11]   ;;  %860 = vst.msk [vmem:[#allocation3 + $0xc0] sm:$0xff] %vm847_vm6, %v3782_v8 }
  0x72   : > { %v1268_v10 = vsel %vm1064_vm2, %v1263_v35, %v1267_v30  ;;  %v1275_v6 = vor.u32 %v1274_v2, %v1270_v60  ;;  %v3785_v16 = vld [vmem:[#allocation2 + $0x9c] sm:$0xff]   ;;  %v1582_v17 = vsel %vm1552_vm7, %v1580_v7, %v1581_v32  ;;  %v1583_v18 = vrot.slane %v3780_v14, 1  ;;  %v3783_v20 = vld [vmem:[#allocation2 + $0x84] sm:$0xfe]   ;;  %v3786_v26 = vld [vmem:[#allocation2 + $0x90] sm:$0xfe]  }
  0x73   : > { %1313 = vrot.lane.b32.xlu0 %v1268_v10, %s3879_s29  ;;  %1634 = vst.msk [vmem:[#allocation3 + $0x98] sm:$0xff] %vm847_vm6, %v1582_v17  ;;  %v1584_v19 = vrot.slane %v3781_v15, 1  ;;  %861 = vst.msk [vmem:[#allocation3 + $0xd0] sm:$0xff] %vm847_vm6, %v3785_v16  ;;  %v3784_v22 = vld [vmem:[#allocation2 + $0x8c] ss:$0 sps:$4 sm:$0x11]  }
  0x74   : > { %v1280_v13 = vsel %vm1064_vm2, %v1275_v6, %v1279_v52  ;;  %v3741_v23 = vld [vmem:[%s5006_s1 + $0xc0] sm:$0xff]   ;;  %v1586_v25 = vrot.slane %v3783_v20, 1  ;;  %v1587_v21 = vrot.slane %v3784_v22, 1  ;;  %v3787_v29 = vld [vmem:[#allocation2 + $0x98] ss:$0 sps:$4 sm:$0x11]  }
  0x75   : > { %1315 = vrot.lane.b32.xlu1 %v1280_v13, %s3879_s29  ;;  %v1585_v24 = vsel %vm1552_vm7, %v1583_v18, %v1584_v19  ;;  %v3788_v30 = vld [vmem:[#allocation2 + $0xa8] sm:$0xff]   ;;  %v1589_v34 = vrot.slane %v3786_v26, 1  ;;  %v1590_v35 = vrot.slane %v3787_v29, 1  ;;  %v3791_v36 = vld [vmem:[#allocation2 + $0xb4] sm:$0xff]   ;;  %v3789_v10 = vld [vmem:[#allocation2 + $0x9c] sm:$0xfe]  }
  0x76   : > { %1635 = vst.msk [vmem:[#allocation3 + $0xa8] sm:$0xff] %vm847_vm6, %v1585_v24  ;;  %v1588_v31 = vsel %vm1552_vm7, %v1586_v25, %v1587_v21  ;;  %862 = vst.msk [vmem:[#allocation3 + $0xe0] sm:$0xff] %vm847_vm6, %v3788_v30  ;;  %v3742_v37 = vld [vmem:[%s5006_s1 + $0xc8] sm:$0xff]   ;;  %v3790_v38 = vld [vmem:[#allocation2 + $0xa4] ss:$0 sps:$4 sm:$0x11]  }
  0x77   : > { %1636 = vst.msk [vmem:[#allocation3 + $0xb8] sm:$0xff] %vm847_vm6, %v1588_v31  ;;  %v1591_v27 = vsel %vm1552_vm7, %v1589_v34, %v1590_v35  ;;  %863 = vst.msk [vmem:[#allocation3 + $0xf0] sm:$0xff] %vm847_vm6, %v3791_v36  ;;  %v3794_v39 = vld [vmem:[#allocation2 + $0xc0] sm:$0xff]   ;;  %v1592_v28 = vrot.slane %v3789_v10, 1  ;;  %v1593_v40 = vrot.slane %v3790_v38, 1  ;;  %v3746_v41 = vld [vmem:[%s5006_s1 + $0xd0] sm:$0xff]  }
  0x78   : > { %1637 = vst.msk [vmem:[#allocation3 + $0xc8] sm:$0xff] %vm847_vm6, %v1591_v27  ;;  %864 = vst.msk [vmem:[#allocation3 + $0x100] sm:$0xff] %vm847_vm6, %v3794_v39  ;;  %v3793_v42 = vld [vmem:[#allocation2 + $0xb0] ss:$0 sps:$4 sm:$0x11]   ;;  %v3750_v51 = vld [vmem:[%s5006_s1 + $0xd8] sm:$0xff]  }
  0x79   : > { %v1594_v11 = vsel %vm1552_vm7, %v1592_v28, %v1593_v40  ;;  %v1596_v44 = vrot.slane %v3793_v42, 1  ;;  %v3795_v46 = vld [vmem:[#allocation2 + $0xb4] sm:$0xfe]   ;;  %v3796_v50 = vld [vmem:[#allocation2 + $0xbc] ss:$0 sps:$4 sm:$0x11]  }
  0x7a   : > { %1638 = vst.msk [vmem:[#allocation3 + $0xd8] sm:$0xff] %vm847_vm6, %v1594_v11  ;;  %v1598_v53 = vrot.slane %v3795_v46, 1  ;;  %v3797_v54 = vld [vmem:[#allocation2 + $0xc0] sm:$0xfe]   ;;  %v1599_v47 = vrot.slane %v3796_v50, 1  ;;  %v3755_v3 = vld [vmem:[%s5006_s1 + $0xe8] sm:$0xff]  }
  0x7b   : > { %v3798_v55 = vld [vmem:[#allocation2 + $0xc8] ss:$0 sps:$4 sm:$0x11]   ;;  %v1601_v56 = vrot.slane %v3797_v54, 1  ;;  %v4372_v60 = vld [vmem:[#allocation3 + $0x28] sm:$0xff]  ;;  %v4399_v6 = vld [vmem:[#allocation3 + $0x38] sm:$0xff] }
  0x7c   : > { %v1600_v58 = vsel %vm1552_vm7, %v1598_v53, %v1599_v47  ;;  %v1602_v59 = vrot.slane %v3798_v55, 1  ;;  %v3751_v1 = vld [vmem:[%s5006_s1 + $0xe0] sm:$0xff]   ;;  %v3803_v5 = vld [vmem:[%s5006_s1 + $0x8] sm:$0xff]   ;;  %v3759_v8 = vld [vmem:[%s5006_s1 + $0xf0] sm:$0xff]   ;;  %s3478_s29 = sshll.u32 %s3932_s2, 5  ;;  %s3814_s2 = scalar_lea.vmem %s4963_s12, 32 }
  0x7d   : > { %1640 = vst.msk [vmem:[#allocation3 + $0xf8] sm:$0xff] %vm847_vm6, %v1600_v58  ;;  %v3802_v2 = vld [vmem:[%s5006_s1] sm:$0xff]   ;;  %v3804_v32 = vld [vmem:[%s5006_s1 + $0x10] sm:$0xff]   ;;  %v3805_v16 = vld [vmem:[%s5006_s1 + $0x18] sm:$0xff]   ;;  %s4961_s16 = scalar_lea.hbm %s5010_s5, %s3478_s29  ;;  %p3815_p11 = scmp.ne.s32.totalorder %s4963_s12, %s3814_s2 }
  0x7e   : > { %v1603_v62 = vsel %vm1552_vm7, %v1601_v56, %v1602_v59  ;;  %v4423_v15 = vld [vmem:[#allocation3 + $0x48] sm:$0xff]  ;;  %v3765_v20 = vld [vmem:[%s5006_s1 + $0x108] sm:$0xff]   ;;  %v4452_v24 = vld [vmem:[#allocation3 + $0x58] sm:$0xff]  ;;  %p3822_p1 = scmp.lt.s32.totalorder %s3820_s24, %s3814_s2 }
  0x7f   : > { %1641 = vst.msk [vmem:[#allocation3 + $0x108] sm:$0xff] %vm847_vm6, %v1603_v62  ;;  %v3764_v17 = vld [vmem:[%s5006_s1 + $0x100] sm:$0xff]   ;;  %v3807_v25 = vld [vmem:[%s5006_s1 + $0x28] sm:$0xff]   ;;  %v3769_v21 = vld [vmem:[%s5006_s1 + $0x110] sm:$0xff]   ;;  %p3816_p12 = pnand %p3815_p11, %p3949_p5 }
  0x80   : > { %v3806_v19 = vld [vmem:[%s5006_s1 + $0x20] sm:$0xff]   ;;  %v3808_v26 = vld [vmem:[%s5006_s1 + $0x30] sm:$0xff]   ;;  %v3770_v29 = vld [vmem:[%s5006_s1 + $0x118] sm:$0xff]   ;;  %p3823_p2 = por %p3822_p1, %p3821_p0 }
  0x81   : > { %v3809_v34 = vld [vmem:[%s5006_s1 + $0x38] sm:$0xff]   ;;  %v3810_v36 = vld [vmem:[%s5006_s1 + $0x40] sm:$0xff]   ;;  %v4498_v27 = vld [vmem:[#allocation3 + $0x78] sm:$0xff]  ;;  %p3817_p13 = pneg %p3816_p12 }
  0x82   : > { %v3811_v38 = vld [vmem:[%s5006_s1 + $0x48] sm:$0xff]   ;;  %v3801_v28 = vld [vmem:[#allocation2 + $0xd4] ss:$0 sps:$4 sm:$0x11]   ;;  %v4520_v46 = vld [vmem:[#allocation3 + $0x88] sm:$0xff] }
  0x83   : > { %v3800_v39 = vld [vmem:[#allocation2 + $0xcc] sm:$0xfe]   ;;  %v1605_v42 = vrot.slane %v3801_v28, 1  ;;  %v1719_v53 = vld [vmem:[#allocation3 + $0xa8] sm:$0xff]  ;;  %p3824_p3 = pnand %p3823_p2, %p3817_p13 }
  0x84   : > { %v3812_v11 = vld [vmem:[%s5006_s1 + $0x50] sm:$0xff]  }
  0x85   : > { %v1721_v55 = vld [vmem:[#allocation3 + $0xb8] sm:$0xff] }
  0x86   : > { %v1725_v59 = vld [vmem:[#allocation3 + $0xd8] sm:$0xff] }
  0x91   : > { %v1282_v12 = vpop.permute.xlu0 %1281 }
  0x92   : > { %1336 = vst.msk [vmem:[#allocation3] sm:$0xff] %vm1335_vm8, %v1282_v12  ;;  %v3760_v12 = vld [vmem:[%s5006_s1 + $0xf8] sm:$0xff]  }
  0x99   : > { %v1643_v33 = vld [vmem:[#allocation3] sm:$0xff] }
  0x9a   : > { %2191 = vmatmul.mubr.bf16.vlgmr.msra.gmra.mrb[0].mxu0 %v1643_v33  ;;  %v4479_v33 = vld [vmem:[#allocation3 + $0x68] sm:$0xff] }
  0x9b   : > { %3378 = vmatprep.mubr.msk.bf16.mxu0 %vm847_vm6, %v4300_v9  ;;  %2498 = vmatpush1.bf16.msra.mxu0 %v3741_v23  ;;  %v3792_v9 = vld [vmem:[#allocation2 + $0xa8] sm:$0xfe]  }
  0x9c   : > { %2499 = vmatprep.subr.bf16.mxu0 %v3878_v0  ;;  %v1595_v43 = vrot.slane %v3792_v9, 1  ;;  %v1604_v9 = vrot.slane %v3800_v39, 1 }
  0x9e   : > { %v1597_v49 = vsel %vm1552_vm7, %v1595_v43, %v1596_v44  ;;  %v1606_v44 = vsel %vm1552_vm7, %v1604_v9, %v1605_v42 }
  0x9f   : > { %2500 = vmatpush1.bf16.msra.mxu0 %v3742_v37  ;;  %1639 = vst.msk [vmem:[#allocation3 + $0xe8] sm:$0xff] %vm847_vm6, %v1597_v49  ;;  %1642 = vst.msk [vmem:[#allocation3 + $0x118] sm:$0xff] %vm847_vm6, %v1606_v44  ;;  %v1717_v49 = vld [vmem:[#allocation3 + $0x98] sm:$0xff] }
  0xa0   : > { %2501 = vmatprep.subr.bf16.mxu0 %v3878_v0 }
  0xa3   : > { %2502 = vmatpush1.bf16.msra.mxu0 %v3746_v41  ;;  %v3799_v41 = vld [vmem:[#allocation2 + $0xcc] sm:$0xff]  }
  0xa4   : > { %2503 = vmatprep.subr.bf16.mxu0 %v3878_v0  ;;  %865 = vst.msk [vmem:[#allocation3 + $0x110] sm:$0xff] %vm847_vm6, %v3799_v41 }
  0xa6   : > { %v1284_v45 = vpop.permute.xlu0 %1283  ;;  %v1727_v62 = vld [vmem:[#allocation3 + $0xe8] sm:$0xff] }
  0xa7   : > { %1337 = vst.msk [vmem:[#allocation3 + $0x10] sm:$0xff] %vm1335_vm8, %v1284_v45  ;;  %v1286_v48 = vpop.permute.xlu1 %1285  ;;  %2504 = vmatpush1.bf16.msra.mxu0 %v3750_v51 }
  0xa8   : > { %1338 = vst.msk [vmem:[#allocation3 + $0x20] sm:$0xff] %vm1335_vm8, %v1286_v48  ;;  %2505 = vmatprep.subr.bf16.mxu0 %v3878_v0  ;;  %v3813_v48 = vld [vmem:[%s5006_s1 + $0x58] sm:$0xff]  }
  0xab   : > { %v1288_v57 = vpop.permute.xlu1 %1287  ;;  %2506 = vmatpush1.bf16.msra.mxu0 %v3751_v1  ;;  %v1729_v1 = vld [vmem:[#allocation3 + $0xf8] sm:$0xff] }
  0xac   : > { %1339 = vst.msk [vmem:[#allocation3 + $0x30] sm:$0xff] %vm1335_vm8, %v1288_v57  ;;  %2507 = vmatprep.subr.bf16.mxu0 %v3878_v0  ;;  %v1723_v57 = vld [vmem:[#allocation3 + $0xc8] sm:$0xff] }
  0xad   : > { %v1290_v61 = vpop.permute.xlu0 %1289 }
  0xae   : > { %v1700_v63 = vld [vmem:[#allocation3 + $0x10] sm:$0xff]  ;;  %1340 = vst.msk [vmem:[#allocation3 + $0x40] sm:$0xff] %vm1335_vm8, %v1290_v61 }
  0xaf   : > { %1910 = vmatmul.mubr.bf16.vlgmr.msra.gmra.mrb[0].mxu1 %v1700_v63  ;;  %2199 = vmatmul.mubr.bf16.gmra.mrb[4].mxu0 %v1700_v63  ;;  %v4393_v52 = vld [vmem:[#allocation3 + $0x20] sm:$0xff] }
  0xb0   : > { %3527 = vmatpush1.bf16.msra.mxu1 %v3802_v2  ;;  %3350 = vmatprep.mubr.msk.bf16.mxu1 %vm847_vm6, %v4372_v60 }
  0xb1   : > { %3379 = vmatprep.mubr.msk.bf16.mxu0 %vm847_vm6, %v4372_v60  ;;  %3516 = vmatprep.subr.bf16.mxu1 %v3878_v0 }
  0xb2   : > { %v1292_v4 = vpop.permute.xlu1 %1291  ;;  %2508 = vmatpush1.bf16.msra.mxu0 %v3755_v3  ;;  %v1731_v3 = vld [vmem:[#allocation3 + $0x108] sm:$0xff] }
  0xb3   : > { %1341 = vst.msk [vmem:[#allocation3 + $0x50] sm:$0xff] %vm1335_vm8, %v1292_v4  ;;  %2509 = vmatprep.subr.bf16.mxu0 %v3878_v0  ;;  %v4421_v13 = vld [vmem:[#allocation3 + $0x30] sm:$0xff] }
  0xb4   : > { %3528 = vmatpush1.bf16.msra.mxu1 %v3803_v5 }
  0xb5   : > { %3517 = vmatprep.subr.bf16.mxu1 %v3878_v0  ;;  %v1294_v7 = vpop.permute.xlu0 %1293  ;;  %v4450_v23 = vld [vmem:[#allocation3 + $0x40] sm:$0xff] }
  0xb6   : > { %1342 = vst.msk [vmem:[#allocation3 + $0x60] sm:$0xff] %vm1335_vm8, %v1294_v7  ;;  %2510 = vmatpush1.bf16.msra.mxu0 %v3759_v8 }
  0xb7   : > { %1918 = vmatmul.mubr.bf16.gmra.mrb[4].mxu1 %v4393_v52  ;;  %2207 = vmatmul.mubr.bf16.gmra.mrb[8].mxu0 %v4393_v52 }
  0xb8   : > { %3351 = vmatprep.mubr.msk.bf16.mxu1 %vm847_vm6, %v4399_v6  ;;  %3380 = vmatprep.mubr.msk.bf16.mxu0 %vm847_vm6, %v4399_v6 }
  0xb9   : > { %3529 = vmatpush1.bf16.msra.mxu1 %v3804_v32  ;;  %2511 = vmatprep.subr.bf16.mxu0 %v3878_v0 }
  0xba   : > { %3518 = vmatprep.subr.bf16.mxu1 %v3878_v0  ;;  %v1296_v14 = vpop.permute.xlu1 %1295  ;;  %2512 = vmatpush1.bf16.msra.mxu0 %v3760_v12  ;;  %v4476_v31 = vld [vmem:[#allocation3 + $0x50] sm:$0xff] }
  0xbb   : > { %1343 = vst.msk [vmem:[#allocation3 + $0x70] sm:$0xff] %vm1335_vm8, %v1296_v14  ;;  %2513 = vmatprep.subr.bf16.mxu0 %v3878_v0 }
  0xbd   : > { %3530 = vmatpush1.bf16.msra.mxu1 %v3805_v16  ;;  %v1298_v18 = vpop.permute.xlu0 %1297  ;;  %v4496_v37 = vld [vmem:[#allocation3 + $0x60] sm:$0xff] }
  0xbe   : > { %3519 = vmatprep.subr.bf16.mxu1 %v3878_v0  ;;  %1344 = vst.msk [vmem:[#allocation3 + $0x80] sm:$0xff] %vm1335_vm8, %v1298_v18  ;;  %2514 = vmatpush1.bf16.msra.mxu0 %v3764_v17 }
  0xbf   : > { %1926 = vmatmul.mubr.bf16.gmra.mrb[8].mxu1 %v4421_v13  ;;  %2215 = vmatmul.mubr.bf16.gmra.mrb[12].mxu0 %v4421_v13 }
  0xc0   : > { %3352 = vmatprep.mubr.msk.bf16.mxu1 %vm847_vm6, %v4423_v15  ;;  %3381 = vmatprep.mubr.msk.bf16.mxu0 %vm847_vm6, %v4423_v15  ;;  %v1300_v22 = vpop.permute.xlu1 %1299 }
  0xc1   : > { %3531 = vmatpush1.bf16.msra.mxu1 %v3806_v19  ;;  %2515 = vmatprep.subr.bf16.mxu0 %v3878_v0  ;;  %1345 = vst.msk [vmem:[#allocation3 + $0x90] sm:$0xff] %vm1335_vm8, %v1300_v22 }
  0xc2   : > { %3520 = vmatprep.subr.bf16.mxu1 %v3878_v0  ;;  %2516 = vmatpush1.bf16.msra.mxu0 %v3765_v20  ;;  %v1712_v45 = vld [vmem:[#allocation3 + $0x70] sm:$0xff] }
  0xc3   : > { %2517 = vmatprep.subr.bf16.mxu0 %v3878_v0 }
  0xc5   : > { %3532 = vmatpush1.bf16.msra.mxu1 %v3807_v25 }
  0xc6   : > { %3521 = vmatprep.subr.bf16.mxu1 %v3878_v0  ;;  %2518 = vmatpush1.bf16.msra.mxu0 %v3769_v21 }
  0xc7   : > { %1934 = vmatmul.mubr.bf16.gmra.mrb[12].mxu1 %v4450_v23  ;;  %2223 = vmatmul.mubr.bf16.gmra.mrb[16].mxu0 %v4450_v23 }
  0xc8   : > { %3353 = vmatprep.mubr.msk.bf16.mxu1 %vm847_vm6, %v4452_v24  ;;  %3382 = vmatprep.mubr.msk.bf16.mxu0 %vm847_vm6, %v4452_v24  ;;  %v1302_v30 = vpop.permute.xlu0 %1301  ;;  %v1716_v51 = vld [vmem:[#allocation3 + $0x90] sm:$0xff] }
  0xc9   : > { %3533 = vmatpush1.bf16.msra.mxu1 %v3808_v26  ;;  %2519 = vmatprep.subr.bf16.mxu0 %v3878_v0  ;;  %1346 = vst.msk [vmem:[#allocation3 + $0xa0] sm:$0xff] %vm1335_vm8, %v1302_v30 }
  0xca   : > { %3522 = vmatprep.subr.bf16.mxu1 %v3878_v0  ;;  %2520 = vmatpush1.bf16.msra.mxu0 %v3770_v29 }
  0xcd   : > { %3534 = vmatpush1.bf16.msra.mxu1 %v3809_v34  ;;  %v1304_v35 = vpop.permute.xlu1 %1303 }
  0xce   : > { %3523 = vmatprep.subr.bf16.mxu1 %v3878_v0  ;;  %1347 = vst.msk [vmem:[#allocation3 + $0xb0] sm:$0xff] %vm1335_vm8, %v1304_v35 }
  0xcf   : > { %1942 = vmatmul.mubr.bf16.gmra.mrb[16].mxu1 %v4476_v31  ;;  %2231 = vmatmul.mubr.bf16.gmra.mrb[20].mxu0 %v4476_v31 }
  0xd0   : > { %3354 = vmatprep.mubr.msk.bf16.mxu1 %vm847_vm6, %v4479_v33  ;;  %3383 = vmatprep.mubr.msk.bf16.mxu0 %vm847_vm6, %v4479_v33  ;;  %v1306_v10 = vpop.permute.xlu0 %1305  ;;  %v1718_v47 = vld [vmem:[#allocation3 + $0xa0] sm:$0xff] }
  0xd1   : > { %3535 = vmatpush1.bf16.msra.mxu1 %v3810_v36  ;;  %1348 = vst.msk [vmem:[#allocation3 + $0xc0] sm:$0xff] %vm1335_vm8, %v1306_v10 }
  0xd2   : > { %3524 = vmatprep.subr.bf16.mxu1 %v3878_v0 }
  0xd3   : > { %v1308_v40 = vpop.permute.xlu1 %1307 }
  0xd4   : > { %1349 = vst.msk [vmem:[#allocation3 + $0xd0] sm:$0xff] %vm1335_vm8, %v1308_v40 }
  0xd5   : > { %3536 = vmatpush1.bf16.msra.mxu1 %v3811_v38  ;;  %v1720_v56 = vld [vmem:[#allocation3 + $0xb0] sm:$0xff] }
  0xd6   : > { %3525 = vmatprep.subr.bf16.mxu1 %v3878_v0  ;;  %v1310_v43 = vpop.permute.xlu0 %1309 }
  0xd7   : > { %1950 = vmatmul.mubr.bf16.gmra.mrb[20].mxu1 %v4496_v37  ;;  %2239 = vmatmul.mubr.bf16.gmra.mrb[24].mxu0 %v4496_v37  ;;  %1350 = vst.msk [vmem:[#allocation3 + $0xe0] sm:$0xff] %vm1335_vm8, %v1310_v43 }
  0xd8   : > { %3355 = vmatprep.mubr.msk.bf16.mxu1 %vm847_vm6, %v4498_v27  ;;  %3384 = vmatprep.mubr.msk.bf16.mxu0 %vm847_vm6, %v4498_v27  ;;  %v1722_v58 = vld [vmem:[#allocation3 + $0xc0] sm:$0xff] }
  0xd9   : > { %3537 = vmatpush1.bf16.msra.mxu1 %v3812_v11 }
  0xda   : > { %3526 = vmatprep.subr.bf16.mxu1 %v3878_v0  ;;  %v1714_v0 = vld [vmem:[#allocation3 + $0x80] sm:$0xff] }
  0xdb   : > { %v1724_v61 = vld [vmem:[#allocation3 + $0xd0] sm:$0xff] }
  0xdc   : > { %v1312_v50 = vpop.permute.xlu1 %1311 }
  0xdd   : > { %3538 = vmatpush1.bf16.msra.mxu1 %v3813_v48  ;;  %1351 = vst.msk [vmem:[#allocation3 + $0xf0] sm:$0xff] %vm1335_vm8, %v1312_v50 }
  0xde   : > { %v1726_v63 = vld [vmem:[#allocation3 + $0xe0] sm:$0xff] }
  0xdf   : > { %1958 = vmatmul.mubr.bf16.gmra.mrb[24].mxu1 %v1712_v45  ;;  %2247 = vmatmul.mubr.bf16.gmra.mrb[28].mxu0 %v1712_v45 }
  0xe0   : > { %3356 = vmatprep.mubr.msk.bf16.mxu1 %vm847_vm6, %v4520_v46  ;;  %3429 = vmatprep.mubr.msk.bf16.mxu0 %vm847_vm6, %v4372_v60 }
  0xe4   : > { %v1728_v2 = vld [vmem:[#allocation3 + $0xf0] sm:$0xff] }
  0xe5   : > { %v1314_v54 = vpop.permute.xlu0 %1313 }
  0xe6   : > { %1352 = vst.msk [vmem:[#allocation3 + $0x100] sm:$0xff] %vm1335_vm8, %v1314_v54 }
  0xe7   : > { %1966 = vmatmul.mubr.bf16.gmra.mrb[28].mxu1 %v1714_v0  ;;  %2530 = vmatmul.mubr.bf16.vlgmr.msra.gmra.mrb[0].mxu0 %v4393_v52  ;;  %v1316_v60 = vpop.permute.xlu1 %1315  ;;  %v2351_v52 = vld [vmem:[#allocation3 + $0x118] sm:$0xff] }
  0xe8   : > { %3357 = vmatprep.mubr.msk.bf16.mxu1 %vm847_vm6, %v1717_v49  ;;  %3430 = vmatprep.mubr.msk.bf16.mxu0 %vm847_vm6, %v4399_v6  ;;  %1353 = vst.msk [vmem:[#allocation3 + $0x110] sm:$0xff] %vm1335_vm8, %v1316_v60 }
  0xed   : > { %v1730_v4 = vld [vmem:[#allocation3 + $0x100] sm:$0xff] }
  0xef   : > { %1974 = vmatmul.mubr.bf16.gmra.mrb[32].mxu1 %v1716_v51  ;;  %2538 = vmatmul.mubr.bf16.gmra.mrb[4].mxu0 %v4421_v13  ;;  %v2350_v5 = vld [vmem:[#allocation3 + $0x110] sm:$0xff] }
  0xf0   : > { %3358 = vmatprep.mubr.msk.bf16.mxu1 %vm847_vm6, %v1719_v53  ;;  %3431 = vmatprep.mubr.msk.bf16.mxu0 %vm847_vm6, %v4423_v15 }
  0xf7   : > { %1982 = vmatmul.mubr.bf16.gmra.mrb[36].mxu1 %v1718_v47  ;;  %2546 = vmatmul.mubr.bf16.gmra.mrb[8].mxu0 %v4450_v23 }
  0xf8   : > { %3359 = vmatprep.mubr.msk.bf16.mxu1 %vm847_vm6, %v1721_v55  ;;  %3432 = vmatprep.mubr.msk.bf16.mxu0 %vm847_vm6, %v4452_v24 }
  0xff   : > { %1990 = vmatmul.mubr.bf16.gmra.mrb[40].mxu1 %v1720_v56  ;;  %2554 = vmatmul.mubr.bf16.gmra.mrb[12].mxu0 %v4476_v31 }
 0x100   : > { %3360 = vmatprep.mubr.msk.bf16.mxu1 %vm847_vm6, %v1723_v57  ;;  %3433 = vmatprep.mubr.msk.bf16.mxu0 %vm847_vm6, %v4479_v33 }
 0x107   : > { %1998 = vmatmul.mubr.bf16.gmra.mrb[44].mxu1 %v1722_v58  ;;  %2562 = vmatmul.mubr.bf16.gmra.mrb[16].mxu0 %v4496_v37 }
 0x108   : > { %3361 = vmatprep.mubr.msk.bf16.mxu1 %vm847_vm6, %v1725_v59  ;;  %3434 = vmatprep.mubr.msk.bf16.mxu0 %vm847_vm6, %v4498_v27 }
 0x10f   : > { %2006 = vmatmul.mubr.bf16.gmra.mrb[48].mxu1 %v1724_v61  ;;  %2570 = vmatmul.mubr.bf16.gmra.mrb[20].mxu0 %v1712_v45 }
 0x110   : > { %3362 = vmatprep.mubr.msk.bf16.mxu1 %vm847_vm6, %v1727_v62  ;;  %3435 = vmatprep.mubr.msk.bf16.mxu0 %vm847_vm6, %v4520_v46 }
 0x117   : > { %2014 = vmatmul.mubr.bf16.gmra.mrb[52].mxu1 %v1726_v63  ;;  %2578 = vmatmul.mubr.bf16.gmra.mrb[24].mxu0 %v1714_v0 }
 0x118   : > { %3363 = vmatprep.mubr.msk.bf16.mxu1 %vm847_vm6, %v1729_v1  ;;  %3436 = vmatprep.mubr.msk.bf16.mxu0 %vm847_vm6, %v1717_v49 }
 0x11f   : > { %2022 = vmatmul.mubr.bf16.gmra.mrb[56].mxu1 %v1728_v2  ;;  %2586 = vmatmul.mubr.bf16.gmra.mrb[28].mxu0 %v1716_v51 }
 0x120   : > { %3364 = vmatprep.mubr.msk.bf16.mxu1 %vm847_vm6, %v1731_v3  ;;  %3437 = vmatprep.mubr.msk.bf16.mxu0 %vm847_vm6, %v1719_v53 }
 0x127   : > { %2030 = vmatmul.mubr.bf16.gmra.mrb[60].mxu1 %v1730_v4  ;;  %2594 = vmatmul.mubr.bf16.gmra.mrb[32].mxu0 %v1718_v47 }
 0x128   : > { %3385 = vmatprep.mubr.msk.bf16.mxu1 %vm847_vm6, %v4520_v46  ;;  %3438 = vmatprep.mubr.msk.bf16.mxu0 %vm847_vm6, %v1721_v55 }
 0x12f   : > { %2255 = vmatmul.mubr.bf16.vlgmr.msra.gmra.mrb[32].mxu1 %v1714_v0  ;;  %2602 = vmatmul.mubr.bf16.gmra.mrb[36].mxu0 %v1720_v56 }
 0x130   : > { %3386 = vmatprep.mubr.msk.bf16.mxu1 %vm847_vm6, %v1717_v49  ;;  %3439 = vmatprep.mubr.msk.bf16.mxu0 %vm847_vm6, %v1723_v57 }
 0x137   : > { %2263 = vmatmul.mubr.bf16.gmra.mrb[36].mxu1 %v1716_v51  ;;  %2610 = vmatmul.mubr.bf16.gmra.mrb[40].mxu0 %v1722_v58 }
 0x138   : > { %3387 = vmatprep.mubr.msk.bf16.mxu1 %vm847_vm6, %v1719_v53  ;;  %3440 = vmatprep.mubr.msk.bf16.mxu0 %vm847_vm6, %v1725_v59 }
 0x13f   : > { %2271 = vmatmul.mubr.bf16.gmra.mrb[40].mxu1 %v1718_v47  ;;  %2618 = vmatmul.mubr.bf16.gmra.mrb[44].mxu0 %v1724_v61 }
 0x140   : > { %3388 = vmatprep.mubr.msk.bf16.mxu1 %vm847_vm6, %v1721_v55  ;;  %3441 = vmatprep.mubr.msk.bf16.mxu0 %vm847_vm6, %v1727_v62 }
 0x147   : > { %2279 = vmatmul.mubr.bf16.gmra.mrb[44].mxu1 %v1720_v56  ;;  %2626 = vmatmul.mubr.bf16.gmra.mrb[48].mxu0 %v1726_v63 }
 0x148   : > { %3389 = vmatprep.mubr.msk.bf16.mxu1 %vm847_vm6, %v1723_v57  ;;  %3442 = vmatprep.mubr.msk.bf16.mxu0 %vm847_vm6, %v1729_v1 }
 0x14f   : > { %2287 = vmatmul.mubr.bf16.gmra.mrb[48].mxu1 %v1722_v58  ;;  %2634 = vmatmul.mubr.bf16.gmra.mrb[52].mxu0 %v1728_v2 }
 0x150   : > { %3390 = vmatprep.mubr.msk.bf16.mxu1 %vm847_vm6, %v1725_v59  ;;  %3443 = vmatprep.mubr.msk.bf16.mxu0 %vm847_vm6, %v1731_v3 }
 0x157   : > { %2295 = vmatmul.mubr.bf16.gmra.mrb[52].mxu1 %v1724_v61  ;;  %2642 = vmatmul.mubr.bf16.gmra.mrb[56].mxu0 %v1730_v4 }
 0x158   : > { %3391 = vmatprep.mubr.msk.bf16.mxu1 %vm847_vm6, %v1727_v62  ;;  %3444 = vmatprep.mubr.msk.bf16.mxu0 %vm847_vm6, %v2351_v52 }
 0x15f   : > { %2303 = vmatmul.mubr.bf16.gmra.mrb[56].mxu1 %v1726_v63  ;;  %2650 = vmatmul.mubr.bf16.gmra.mrb[60].mxu0 %v2350_v5 }
 0x160   : > { %3392 = vmatprep.mubr.msk.bf16.mxu1 %vm847_vm6, %v1729_v1 }
 0x167   : > { %2311 = vmatmul.mubr.bf16.gmra.mrb[60].mxu1 %v1728_v2 }
 0x182   : > { %v1911_v6 = vpop.f32.mrb[0].mxu1 }
 0x183   : > { %v1913_v7 = vpop.f32.mrb[1].mxu1 }
 0x184   : > { %v1914_v8 = vpop.f32.mrb[2].mxu1 }
 0x185   : > { %v1916_v32 = vpop.f32.mrb[3].mxu1 }
 0x18a   : > { %v1919_v12 = vpop.f32.mrb[4].mxu1 }
 0x18b   : > { %v1921_v13 = vpop.f32.mrb[5].mxu1 }
 0x18c   : > { %v1922_v14 = vpop.f32.mrb[6].mxu1 }
 0x18d   : > { %v1924_v15 = vpop.f32.mrb[7].mxu1 }
 0x192   : > { %v1927_v16 = vpop.f32.mrb[8].mxu1 }
 0x193   : > { %v1929_v17 = vpop.f32.mrb[9].mxu1 }
 0x194   : > { %v1930_v18 = vpop.f32.mrb[10].mxu1 }
 0x195   : > { %v1932_v19 = vpop.f32.mrb[11].mxu1 }
 0x19a   : > { %v1935_v20 = vpop.f32.mrb[12].mxu1 }
 0x19b   : > { %v1937_v22 = vpop.f32.mrb[13].mxu1 }
 0x19c   : > { %v1938_v23 = vpop.f32.mrb[14].mxu1 }
 0x19d   : > { %v1940_v24 = vpop.f32.mrb[15].mxu1 }
 0x1a2   : > { %v1943_v25 = vpop.f32.mrb[16].mxu1 }
 0x1a3   : > { %v1945_v21 = vpop.f32.mrb[17].mxu1 }
 0x1a4   : > { %v4575_v26 = vpop.f32.mrb[18].mxu1 }
 0x1a5   : > { %v1948_v29 = vpop.f32.mrb[19].mxu1 }
 0x1aa   : > { %v4577_v30 = vpop.f32.mrb[20].mxu1 }
 0x1ab   : > { %v1953_v31 = vpop.f32.mrb[21].mxu1 }
 0x1ac   : > { %v4579_v33 = vpop.f32.mrb[22].mxu1 }
 0x1ad   : > { %v1956_v34 = vpop.f32.mrb[23].mxu1 }
 0x1b2   : > { %v4581_v35 = vpop.f32.mrb[24].mxu1 }
 0x1b3   : > { %v1961_v36 = vpop.f32.mrb[25].mxu1 }
 0x1b4   : > { %v4583_v37 = vpop.f32.mrb[26].mxu1 }
 0x1b5   : > { %v1964_v10 = vpop.f32.mrb[27].mxu1 }
 0x1ba   : > { %v4586_v27 = vpop.f32.mrb[28].mxu1  ;;  %v2531_v38 = vpop.f32.mrb[0].mxu0 }
 0x1bb   : > { %v4588_v39 = vadd.f32 %v2531_v38, %v1911_v6  ;;  %v1969_v28 = vpop.f32.mrb[29].mxu1  ;;  %v2533_v40 = vpop.f32.mrb[1].mxu0 }
 0x1bc   : > { %v4595_v41 = vpop.f32.mrb[30].mxu1  ;;  %v2534_v9 = vpop.f32.mrb[2].mxu0 }
 0x1bd   : > { %v3483_v42 = vpack.c.bf16 %v4588_v39, %v4588_v39  ;;  %v4599_v11 = vadd.f32 %v2534_v9, %v1914_v8  ;;  %v1972_v43 = vpop.f32.mrb[31].mxu1  ;;  %v2536_v44 = vpop.f32.mrb[3].mxu0  ;;  %v2850_v13 = vsel %vm847_vm6, %v4588_v39, 0.0 }
 0x1bf   : > { %2818 = vst.msk [vmem:[%s4593_s13] sm:$0xf] %vm647_vm0, %v3483_v42  ;;  %v3484_v45 = vpack.c.bf16 %v4599_v11, %v4599_v11  ;;  %v2851_v7 = vsel %vm847_vm6, %v4599_v11, 0.0 }
 0x1c1   : > { %2819 = vst.msk [vmem:[%s4593_s13 + $0x4] sm:$0xf] %vm647_vm0, %v3484_v45 }
 0x1c2   : > { %v2539_v46 = vpop.f32.mrb[4].mxu0 }
 0x1c3   : > { %v4607_v48 = vadd.f32 %v2539_v46, %v1919_v12  ;;  %v2541_v0 = vpop.f32.mrb[5].mxu0 }
 0x1c4   : > { %v2542_v49 = vpop.f32.mrb[6].mxu0 }
 0x1c5   : > { %v3485_v50 = vpack.c.bf16 %v4607_v48, %v4607_v48  ;;  %v4611_v51 = vadd.f32 %v2542_v49, %v1922_v14  ;;  %v2544_v53 = vpop.f32.mrb[7].mxu0  ;;  %v2853_v14 = vsel %vm847_vm6, %v4607_v48, 0.0 }
 0x1c7   : > { %2820 = vst.msk [vmem:[%s4593_s13 + $0x8] sm:$0xf] %vm647_vm0, %v3485_v50  ;;  %v3486_v54 = vpack.c.bf16 %v4611_v51, %v4611_v51  ;;  %v2855_v22 = vsel %vm847_vm6, %v4611_v51, 0.0 }
 0x1c9   : > { %2821 = vst.msk [vmem:[%s4593_s13 + $0xc] sm:$0xf] %vm647_vm0, %v3486_v54 }
 0x1ca   : > { %v2547_v47 = vpop.f32.mrb[8].mxu0 }
 0x1cb   : > { %v4619_v55 = vadd.f32 %v2547_v47, %v1927_v16  ;;  %v2549_v56 = vpop.f32.mrb[9].mxu0 }
 0x1cc   : > { %v2550_v57 = vpop.f32.mrb[10].mxu0 }
 0x1cd   : > { %v3487_v58 = vpack.c.bf16 %v4619_v55, %v4619_v55  ;;  %v4623_v59 = vadd.f32 %v2550_v57, %v1930_v18  ;;  %v2552_v60 = vpop.f32.mrb[11].mxu0  ;;  %v2852_v18 = vadd.f32 %v2851_v7, %v2850_v13  ;;  %v2857_v24 = vsel %vm847_vm6, %v4619_v55, 0.0 }
 0x1cf   : > { %2822 = vst.msk [vmem:[%s4593_s13 + $0x10] sm:$0xf] %vm647_vm0, %v3487_v58  ;;  %v3488_v61 = vpack.c.bf16 %v4623_v59, %v4623_v59  ;;  %v2859_v38 = vsel %vm847_vm6, %v4623_v59, 0.0 }
 0x1d1   : > { %2823 = vst.msk [vmem:[%s4593_s13 + $0x14] sm:$0xf] %vm647_vm0, %v3488_v61 }
 0x1d2   : > { %v2555_v62 = vpop.f32.mrb[12].mxu0 }
 0x1d3   : > { %v4631_v63 = vadd.f32 %v2555_v62, %v1935_v20  ;;  %v2557_v1 = vpop.f32.mrb[13].mxu0  ;;  %v2854_v20 = vadd.f32 %v2853_v14, %v2852_v18 }
 0x1d4   : > { %v2558_v2 = vpop.f32.mrb[14].mxu0 }
 0x1d5   : > { %v3489_v3 = vpack.c.bf16 %v4631_v63, %v4631_v63  ;;  %v4635_v4 = vadd.f32 %v2558_v2, %v1938_v23  ;;  %v2560_v52 = vpop.f32.mrb[15].mxu0  ;;  %v2861_v28 = vsel %vm847_vm6, %v4631_v63, 0.0 }
 0x1d7   : > { %2824 = vst.msk [vmem:[%s4593_s13 + $0x18] sm:$0xf] %vm647_vm0, %v3489_v3  ;;  %v3490_v5 = vpack.c.bf16 %v4635_v4, %v4635_v4  ;;  %v2863_v45 = vsel %vm847_vm6, %v4635_v4, 0.0 }
 0x1d9   : > { %2825 = vst.msk [vmem:[%s4593_s13 + $0x1c] sm:$0xf] %vm647_vm0, %v3490_v5 }
 0x1da   : > { %v2563_v6 = vpop.f32.mrb[16].mxu0 }
 0x1db   : > { %v4645_v8 = vadd.f32 %v2563_v6, %v1943_v25  ;;  %v2565_v32 = vpop.f32.mrb[17].mxu0 }
 0x1dc   : > { %v2566_v12 = vpop.f32.mrb[18].mxu0 }
 0x1dd   : > { %v3491_v15 = vpack.c.bf16 %v4645_v8, %v4645_v8  ;;  %v4654_v16 = vadd.f32 %v2566_v12, %v4575_v26  ;;  %v2568_v17 = vpop.f32.mrb[19].mxu0  ;;  %v2856_v26 = vadd.f32 %v2855_v22, %v2854_v20  ;;  %v2865_v50 = vsel %vm847_vm6, %v4645_v8, 0.0 }
 0x1df   : > { %2826 = vst.msk [vmem:[%s4593_s13 + $0x20] sm:$0xf] %vm647_vm0, %v3491_v15  ;;  %v3492_v19 = vpack.c.bf16 %v4654_v16, %v4654_v16  ;;  %v2858_v10 = vadd.f32 %v2857_v24, %v2856_v26 }
 0x1e1   : > { %2827 = vst.msk [vmem:[%s4593_s13 + $0x24] sm:$0xf] %vm647_vm0, %v3492_v19  ;;  %v2860_v40 = vadd.f32 %v2859_v38, %v2858_v10 }
 0x1e2   : > { %v2571_v23 = vpop.f32.mrb[20].mxu0 }
 0x1e3   : > { %v4667_v25 = vadd.f32 %v2571_v23, %v4577_v30  ;;  %v2573_v21 = vpop.f32.mrb[21].mxu0  ;;  %v2862_v43 = vadd.f32 %v2861_v28, %v2860_v40 }
 0x1e4   : > { %v2574_v29 = vpop.f32.mrb[22].mxu0 }
 0x1e5   : > { %v3493_v31 = vpack.c.bf16 %v4667_v25, %v4667_v25  ;;  %v4672_v34 = vadd.f32 %v2574_v29, %v4579_v33  ;;  %v2576_v36 = vpop.f32.mrb[23].mxu0  ;;  %v2864_v53 = vadd.f32 %v2863_v45, %v2862_v43  ;;  %v2869_v60 = vsel %vm847_vm6, %v4667_v25, 0.0 }
 0x1e7   : > { %2828 = vst.msk [vmem:[%s4593_s13 + $0x28] sm:$0xf] %vm647_vm0, %v3493_v31  ;;  %v3494_v30 = vpack.c.bf16 %v4672_v34, %v4672_v34  ;;  %v2866_v54 = vadd.f32 %v2865_v50, %v2864_v53  ;;  %v2871_v52 = vsel %vm847_vm6, %v4672_v34, 0.0 }
 0x1e9   : > { %2829 = vst.msk [vmem:[%s4593_s13 + $0x2c] sm:$0xf] %vm647_vm0, %v3494_v30 }
 0x1ea   : > { %v2579_v33 = vpop.f32.mrb[24].mxu0 }
 0x1eb   : > { %v4685_v9 = vadd.f32 %v2579_v33, %v4581_v35  ;;  %v2581_v42 = vpop.f32.mrb[25].mxu0 }
 0x1ec   : > { %v2582_v44 = vpop.f32.mrb[26].mxu0 }
 0x1ed   : > { %v3495_v46 = vpack.c.bf16 %v4685_v9, %v4685_v9  ;;  %v4692_v0 = vadd.f32 %v2582_v44, %v4583_v37  ;;  %v2584_v49 = vpop.f32.mrb[27].mxu0  ;;  %v2867_v37 = vsel %vm847_vm6, %v4654_v16, 0.0  ;;  %v2873_v6 = vsel %vm847_vm6, %v4685_v9, 0.0 }
 0x1ee   : > { %v2868_v2 = vadd.f32 %v2867_v37, %v2866_v54 }
 0x1ef   : > { %2830 = vst.msk [vmem:[%s4593_s13 + $0x30] sm:$0xf] %vm647_vm0, %v3495_v46  ;;  %v3496_v35 = vpack.c.bf16 %v4692_v0, %v4692_v0  ;;  %v2875_v14 = vsel %vm847_vm6, %v4692_v0, 0.0 }
 0x1f1   : > { %2831 = vst.msk [vmem:[%s4593_s13 + $0x34] sm:$0xf] %vm647_vm0, %v3496_v35 }
 0x1f2   : > { %v2587_v47 = vpop.f32.mrb[28].mxu0 }
 0x1f3   : > { %v4705_v56 = vadd.f32 %v2587_v47, %v4586_v27  ;;  %v2589_v57 = vpop.f32.mrb[29].mxu0  ;;  %v2870_v27 = vadd.f32 %v2869_v60, %v2868_v2 }
 0x1f4   : > { %v2590_v58 = vpop.f32.mrb[30].mxu0 }
 0x1f5   : > { %v3497_v61 = vpack.c.bf16 %v4705_v56, %v4705_v56  ;;  %v4712_v62 = vadd.f32 %v2590_v58, %v4595_v41  ;;  %v2592_v1 = vpop.f32.mrb[31].mxu0  ;;  %v2872_v41 = vadd.f32 %v2871_v52, %v2870_v27  ;;  %v2877_v15 = vsel %vm847_vm6, %v4705_v56, 0.0 }
 0x1f7   : > { %2832 = vst.msk [vmem:[%s4593_s13 + $0x38] sm:$0xf] %vm647_vm0, %v3497_v61  ;;  %v3498_v3 = vpack.c.bf16 %v4712_v62, %v4712_v62  ;;  %v2874_v13 = vadd.f32 %v2873_v6, %v2872_v41  ;;  %v2879_v29 = vsel %vm847_vm6, %v4712_v62, 0.0 }
 0x1f9   : > { %2833 = vst.msk [vmem:[%s4593_s13 + $0x3c] sm:$0xf] %vm647_vm0, %v3498_v3  ;;  %v2876_v17 = vadd.f32 %v2875_v14, %v2874_v13 }
 0x1fa   : > { %v2595_v5 = vpop.f32.mrb[32].mxu0 }
 0x1fb   : > { %v2597_v7 = vpop.f32.mrb[33].mxu0  ;;  %v2878_v24 = vadd.f32 %v2877_v15, %v2876_v17 }
 0x1fc   : > { %v2598_v32 = vpop.f32.mrb[34].mxu0 }
 0x1fd   : > { %v2600_v12 = vpop.f32.mrb[35].mxu0  ;;  %v2880_v40 = vadd.f32 %v2879_v29, %v2878_v24 }
 0x202   : > { %v2256_v18 = vpop.f32.mrb[32].mxu1  ;;  %v2603_v19 = vpop.f32.mrb[36].mxu0 }
 0x203   : > { %v4728_v20 = vadd.f32 %v2595_v5, %v2256_v18  ;;  %v2258_v22 = vpop.f32.mrb[33].mxu1  ;;  %v2605_v23 = vpop.f32.mrb[37].mxu0 }
 0x204   : > { %v2259_v21 = vpop.f32.mrb[34].mxu1  ;;  %v2606_v26 = vpop.f32.mrb[38].mxu0 }
 0x205   : > { %v3499_v31 = vpack.c.bf16 %v4728_v20, %v4728_v20  ;;  %v4734_v36 = vadd.f32 %v2598_v32, %v2259_v21  ;;  %v2261_v10 = vpop.f32.mrb[35].mxu1  ;;  %v2608_v38 = vpop.f32.mrb[39].mxu0  ;;  %v2881_v30 = vsel %vm847_vm6, %v4728_v20, 0.0 }
 0x206   : > { %v2882_v33 = vadd.f32 %v2881_v30, %v2880_v40 }
 0x207   : > { %2834 = vst.msk [vmem:[%s4593_s13 + $0x40] sm:$0xf] %vm647_vm0, %v3499_v31  ;;  %v3500_v28 = vpack.c.bf16 %v4734_v36, %v4734_v36  ;;  %v2883_v44 = vsel %vm847_vm6, %v4734_v36, 0.0 }
 0x208   : > { %v2884_v58 = vadd.f32 %v2883_v44, %v2882_v33 }
 0x209   : > { %2835 = vst.msk [vmem:[%s4593_s13 + $0x44] sm:$0xf] %vm647_vm0, %v3500_v28 }
 0x20a   : > { %v2264_v42 = vpop.f32.mrb[36].mxu1  ;;  %v2611_v43 = vpop.f32.mrb[40].mxu0 }
 0x20b   : > { %v4746_v45 = vadd.f32 %v2603_v19, %v2264_v42  ;;  %v2266_v46 = vpop.f32.mrb[37].mxu1  ;;  %v2613_v49 = vpop.f32.mrb[41].mxu0 }
 0x20c   : > { %v2267_v50 = vpop.f32.mrb[38].mxu1  ;;  %v2614_v35 = vpop.f32.mrb[42].mxu0 }
 0x20d   : > { %v3501_v53 = vpack.c.bf16 %v4746_v45, %v4746_v45  ;;  %v2885_v54 = vsel %vm847_vm6, %v4746_v45, 0.0  ;;  %v4752_v47 = vadd.f32 %v2606_v26, %v2267_v50  ;;  %v2269_v37 = vpop.f32.mrb[39].mxu1  ;;  %v2616_v57 = vpop.f32.mrb[43].mxu0 }
 0x20e   : > { %v2886_v61 = vadd.f32 %v2885_v54, %v2884_v58 }
 0x20f   : > { %2836 = vst.msk [vmem:[%s4593_s13 + $0x48] sm:$0xf] %vm647_vm0, %v3501_v53  ;;  %v3502_v60 = vpack.c.bf16 %v4752_v47, %v4752_v47  ;;  %v2887_v1 = vsel %vm847_vm6, %v4752_v47, 0.0 }
 0x210   : > { %v2888_v6 = vadd.f32 %v2887_v1, %v2886_v61 }
 0x211   : > { %2837 = vst.msk [vmem:[%s4593_s13 + $0x4c] sm:$0xf] %vm647_vm0, %v3502_v60 }
 0x212   : > { %v2272_v2 = vpop.f32.mrb[40].mxu1  ;;  %v2619_v3 = vpop.f32.mrb[44].mxu0 }
 0x213   : > { %v4762_v27 = vadd.f32 %v2611_v43, %v2272_v2  ;;  %v2274_v52 = vpop.f32.mrb[41].mxu1  ;;  %v2621_v5 = vpop.f32.mrb[45].mxu0 }
 0x214   : > { %v2275_v7 = vpop.f32.mrb[42].mxu1  ;;  %v2622_v41 = vpop.f32.mrb[46].mxu0 }
 0x215   : > { %v3503_v32 = vpack.c.bf16 %v4762_v27, %v4762_v27  ;;  %v2889_v12 = vsel %vm847_vm6, %v4762_v27, 0.0  ;;  %v4768_v13 = vadd.f32 %v2614_v35, %v2275_v7  ;;  %v2277_v14 = vpop.f32.mrb[43].mxu1  ;;  %v2624_v15 = vpop.f32.mrb[47].mxu0 }
 0x216   : > { %v2890_v17 = vadd.f32 %v2889_v12, %v2888_v6 }
 0x217   : > { %2838 = vst.msk [vmem:[%s4593_s13 + $0x50] sm:$0xf] %vm647_vm0, %v3503_v32  ;;  %v3504_v18 = vpack.c.bf16 %v4768_v13, %v4768_v13  ;;  %v2891_v19 = vsel %vm847_vm6, %v4768_v13, 0.0 }
 0x218   : > { %v2892_v22 = vadd.f32 %v2891_v19, %v2890_v17 }
 0x219   : > { %2839 = vst.msk [vmem:[%s4593_s13 + $0x54] sm:$0xf] %vm647_vm0, %v3504_v18 }
 0x21a   : > { %v2280_v23 = vpop.f32.mrb[44].mxu1  ;;  %v2627_v24 = vpop.f32.mrb[48].mxu0 }
 0x21b   : > { %v4778_v21 = vadd.f32 %v2619_v3, %v2280_v23  ;;  %v2282_v26 = vpop.f32.mrb[45].mxu1  ;;  %v2629_v29 = vpop.f32.mrb[49].mxu0 }
 0x21c   : > { %v2283_v31 = vpop.f32.mrb[46].mxu1  ;;  %v2630_v10 = vpop.f32.mrb[50].mxu0 }
 0x21d   : > { %v3505_v38 = vpack.c.bf16 %v4778_v21, %v4778_v21  ;;  %v2893_v30 = vsel %vm847_vm6, %v4778_v21, 0.0  ;;  %v4784_v28 = vadd.f32 %v2622_v41, %v2283_v31  ;;  %v2285_v40 = vpop.f32.mrb[47].mxu1  ;;  %v2632_v33 = vpop.f32.mrb[51].mxu0 }
 0x21e   : > { %v2894_v42 = vadd.f32 %v2893_v30, %v2892_v22 }
 0x21f   : > { %2840 = vst.msk [vmem:[%s4593_s13 + $0x58] sm:$0xf] %vm647_vm0, %v3505_v38  ;;  %v3506_v43 = vpack.c.bf16 %v4784_v28, %v4784_v28  ;;  %v2895_v44 = vsel %vm847_vm6, %v4784_v28, 0.0 }
 0x220   : > { %v2896_v46 = vadd.f32 %v2895_v44, %v2894_v42 }
 0x221   : > { %2841 = vst.msk [vmem:[%s4593_s13 + $0x5c] sm:$0xf] %vm647_vm0, %v3506_v43 }
 0x222   : > { %v2288_v49 = vpop.f32.mrb[48].mxu1  ;;  %v2635_v50 = vpop.f32.mrb[52].mxu0 }
 0x223   : > { %v4794_v35 = vadd.f32 %v2627_v24, %v2288_v49  ;;  %v2290_v53 = vpop.f32.mrb[49].mxu1  ;;  %v2637_v54 = vpop.f32.mrb[53].mxu0 }
 0x224   : > { %v2291_v37 = vpop.f32.mrb[50].mxu1  ;;  %v2638_v57 = vpop.f32.mrb[54].mxu0 }
 0x225   : > { %v3507_v58 = vpack.c.bf16 %v4794_v35, %v4794_v35  ;;  %v2897_v60 = vsel %vm847_vm6, %v4794_v35, 0.0  ;;  %v4800_v61 = vadd.f32 %v2630_v10, %v2291_v37  ;;  %v2293_v1 = vpop.f32.mrb[51].mxu1  ;;  %v2640_v2 = vpop.f32.mrb[55].mxu0 }
 0x226   : > { %v2898_v3 = vadd.f32 %v2897_v60, %v2896_v46 }
 0x227   : > { %2842 = vst.msk [vmem:[%s4593_s13 + $0x60] sm:$0xf] %vm647_vm0, %v3507_v58  ;;  %v3508_v52 = vpack.c.bf16 %v4800_v61, %v4800_v61  ;;  %v2899_v5 = vsel %vm847_vm6, %v4800_v61, 0.0 }
 0x228   : > { %v2900_v6 = vadd.f32 %v2899_v5, %v2898_v3 }
 0x229   : > { %2843 = vst.msk [vmem:[%s4593_s13 + $0x64] sm:$0xf] %vm647_vm0, %v3508_v52 }
 0x22a   : > { %v2296_v7 = vpop.f32.mrb[52].mxu1  ;;  %v2643_v41 = vpop.f32.mrb[56].mxu0 }
 0x22b   : > { %v4810_v32 = vadd.f32 %v2635_v50, %v2296_v7  ;;  %v2298_v12 = vpop.f32.mrb[53].mxu1  ;;  %v2645_v14 = vpop.f32.mrb[57].mxu0 }
 0x22c   : > { %v2299_v15 = vpop.f32.mrb[54].mxu1  ;;  %v2646_v17 = vpop.f32.mrb[58].mxu0 }
 0x22d   : > { %v3509_v18 = vpack.c.bf16 %v4810_v32, %v4810_v32  ;;  %v2901_v19 = vsel %vm847_vm6, %v4810_v32, 0.0  ;;  %v4816_v22 = vadd.f32 %v2638_v57, %v2299_v15  ;;  %v2301_v23 = vpop.f32.mrb[55].mxu1  ;;  %v2648_v24 = vpop.f32.mrb[59].mxu0 }
 0x22e   : > { %v2902_v26 = vadd.f32 %v2901_v19, %v2900_v6 }
 0x22f   : > { %2844 = vst.msk [vmem:[%s4593_s13 + $0x68] sm:$0xf] %vm647_vm0, %v3509_v18  ;;  %v3510_v29 = vpack.c.bf16 %v4816_v22, %v4816_v22  ;;  %v2903_v31 = vsel %vm847_vm6, %v4816_v22, 0.0 }
 0x230   : > { %v2904_v10 = vadd.f32 %v2903_v31, %v2902_v26 }
 0x231   : > { %2845 = vst.msk [vmem:[%s4593_s13 + $0x6c] sm:$0xf] %vm647_vm0, %v3510_v29 }
 0x232   : > { %v2304_v38 = vpop.f32.mrb[56].mxu1  ;;  %v2651_v30 = vpop.f32.mrb[60].mxu0 }
 0x233   : > { %v4826_v40 = vadd.f32 %v2643_v41, %v2304_v38  ;;  %v2306_v33 = vpop.f32.mrb[57].mxu1  ;;  %v2653_v42 = vpop.f32.mrb[61].mxu0 }
 0x234   : > { %v2307_v43 = vpop.f32.mrb[58].mxu1  ;;  %v2654_v44 = vpop.f32.mrb[62].mxu0 }
 0x235   : > { %v3511_v46 = vpack.c.bf16 %v4826_v40, %v4826_v40  ;;  %v2905_v49 = vsel %vm847_vm6, %v4826_v40, 0.0  ;;  %v4832_v50 = vadd.f32 %v2646_v17, %v2307_v43  ;;  %v2309_v53 = vpop.f32.mrb[59].mxu1  ;;  %v2656_v54 = vpop.f32.mrb[63].mxu0 }
 0x236   : > { %v2906_v37 = vadd.f32 %v2905_v49, %v2904_v10 }
 0x237   : > { %2846 = vst.msk [vmem:[%s4593_s13 + $0x70] sm:$0xf] %vm647_vm0, %v3511_v46  ;;  %v3512_v57 = vpack.c.bf16 %v4832_v50, %v4832_v50  ;;  %v2907_v58 = vsel %vm847_vm6, %v4832_v50, 0.0 }
 0x238   : > { %v2908_v60 = vadd.f32 %v2907_v58, %v2906_v37 }
 0x239   : > { %2847 = vst.msk [vmem:[%s4593_s13 + $0x74] sm:$0xf] %vm647_vm0, %v3512_v57 }
 0x23a   : > { %v2312_v1 = vpop.f32.mrb[60].mxu1 }
 0x23b   : > { %v4842_v2 = vadd.f32 %v2651_v30, %v2312_v1  ;;  %v2314_v3 = vpop.f32.mrb[61].mxu1 }
 0x23c   : > { %v2315_v52 = vpop.f32.mrb[62].mxu1 }
 0x23d   : > { %v3513_v5 = vpack.c.bf16 %v4842_v2, %v4842_v2  ;;  %v2909_v6 = vsel %vm847_vm6, %v4842_v2, 0.0  ;;  %v4848_v7 = vadd.f32 %v2654_v44, %v2315_v52  ;;  %v2317_v41 = vpop.f32.mrb[63].mxu1 }
 0x23e   : > { %v2910_v12 = vadd.f32 %v2909_v6, %v2908_v60 }
 0x23f   : > { %2848 = vst.msk [vmem:[%s4593_s13 + $0x78] sm:$0xf] %vm647_vm0, %v3513_v5  ;;  %v3514_v14 = vpack.c.bf16 %v4848_v7, %v4848_v7  ;;  %v2911_v15 = vsel %vm847_vm6, %v4848_v7, 0.0 }
 0x240   : > { %v2912_v17 = vadd.f32 %v2911_v15, %v2910_v12 }
 0x241   : > { %2849 = vst.msk [vmem:[%s4593_s13 + $0x7c] sm:$0xf] %vm647_vm0, %v3514_v14 }
 0x242   : > { %v2913_v18 = vrot.slane %v2912_v17, 4 }
 0x244   : > { %v2914_v19 = vadd.f32 %v2913_v18, %v2912_v17 }
 0x246   : > { %v2915_v23 = vrot.slane %v2914_v19, 2 }
 0x248   : > { %v2916_v24 = vadd.f32 %v2915_v23, %v2914_v19 }
 0x24a   : > { %v2917_v26 = vrot.slane %v2916_v24, 1 }
 0x24c   : > { %v2918_v29 = vadd.f32 %v2917_v26, %v2916_v24 }
 0x24e   : > { %v4858_v31 = vmul.f32 0.00390625, %v2918_v29 }
 0x250   : > { %v2921_v10 = vsub.f32 %v4588_v39, %v4858_v31  ;;  %v2922_v38 = vsub.f32 %v4599_v11, %v4858_v31  ;;  %v2923_v30 = vsub.f32 %v4607_v48, %v4858_v31  ;;  %v2924_v33 = vsub.f32 %v4611_v51, %v4858_v31 }
 0x251   : > { %v2925_v44 = vsub.f32 %v4619_v55, %v4858_v31  ;;  %v2926_v49 = vsub.f32 %v4623_v59, %v4858_v31  ;;  %v2927_v48 = vsub.f32 %v4631_v63, %v4858_v31  ;;  %v2928_v55 = vsub.f32 %v4635_v4, %v4858_v31 }
 0x252   : > { %v2953_v42 = vmul.f32 %v2921_v10, %v2921_v10  ;;  %v2954_v43 = vmul.f32 %v2922_v38, %v2922_v38  ;;  %v2955_v46 = vmul.f32 %v2923_v30, %v2923_v30  ;;  %v2956_v53 = vmul.f32 %v2924_v33, %v2924_v33 }
 0x253   : > { %v2957_v37 = vmul.f32 %v2925_v44, %v2925_v44  ;;  %v2958_v58 = vmul.f32 %v2926_v49, %v2926_v49  ;;  %v2929_v1 = vsub.f32 %v4645_v8, %v4858_v31  ;;  %v2959_v3 = vmul.f32 %v2927_v48, %v2927_v48 }
 0x254   : > { %v2985_v39 = vsel %vm847_vm6, %v2953_v42, 0.0  ;;  %v2986_v11 = vsel %vm847_vm6, %v2954_v43, 0.0  ;;  %v2988_v51 = vsel %vm847_vm6, %v2955_v46, 0.0  ;;  %v2990_v60 = vsel %vm847_vm6, %v2956_v53, 0.0 }
 0x255   : > { %v2987_v54 = vadd.f32 %v2986_v11, %v2985_v39  ;;  %v2992_v52 = vsel %vm847_vm6, %v2957_v37, 0.0  ;;  %v2930_v63 = vsub.f32 %v4654_v16, %v4858_v31  ;;  %v2960_v6 = vmul.f32 %v2928_v55, %v2928_v55 }
 0x256   : > { %v2994_v41 = vsel %vm847_vm6, %v2958_v58, 0.0  ;;  %v2931_v4 = vsub.f32 %v4667_v25, %v4858_v31  ;;  %v2961_v14 = vmul.f32 %v2929_v1, %v2929_v1  ;;  %v2996_v15 = vsel %vm847_vm6, %v2959_v3, 0.0 }
 0x257   : > { %v2989_v57 = vadd.f32 %v2988_v51, %v2987_v54  ;;  %v2932_v8 = vsub.f32 %v4672_v34, %v4858_v31  ;;  %v2962_v18 = vmul.f32 %v2930_v63, %v2930_v63  ;;  %v2998_v19 = vsel %vm847_vm6, %v2960_v6, 0.0 }
 0x258   : > { %v2933_v16 = vsub.f32 %v4685_v9, %v4858_v31  ;;  %v2963_v24 = vmul.f32 %v2931_v4, %v2931_v4  ;;  %v3000_v26 = vsel %vm847_vm6, %v2961_v14, 0.0  ;;  %v2934_v25 = vsub.f32 %v4692_v0, %v4858_v31 }
 0x259   : > { %v2991_v59 = vadd.f32 %v2990_v60, %v2989_v57  ;;  %v2964_v10 = vmul.f32 %v2932_v8, %v2932_v8  ;;  %v3002_v38 = vsel %vm847_vm6, %v2962_v18, 0.0  ;;  %v2935_v34 = vsub.f32 %v4705_v56, %v4858_v31 }
 0x25a   : > { %v2965_v33 = vmul.f32 %v2933_v16, %v2933_v16  ;;  %v3004_v42 = vsel %vm847_vm6, %v2963_v24, 0.0  ;;  %v2936_v9 = vsub.f32 %v4712_v62, %v4858_v31  ;;  %v2966_v44 = vmul.f32 %v2934_v25, %v2934_v25 }
 0x25b   : > { %v2993_v5 = vadd.f32 %v2992_v52, %v2991_v59  ;;  %v3006_v46 = vsel %vm847_vm6, %v2964_v10, 0.0  ;;  %v2937_v0 = vsub.f32 %v4728_v20, %v4858_v31  ;;  %v2967_v53 = vmul.f32 %v2935_v34, %v2935_v34 }
 0x25c   : > { %v3008_v39 = vsel %vm847_vm6, %v2965_v33, 0.0  ;;  %v2938_v56 = vsub.f32 %v4734_v36, %v4858_v31  ;;  %v2968_v54 = vmul.f32 %v2936_v9, %v2936_v9  ;;  %v3010_v48 = vsel %vm847_vm6, %v2966_v44, 0.0 }
 0x25d   : > { %v2995_v12 = vadd.f32 %v2994_v41, %v2993_v5  ;;  %v2939_v62 = vsub.f32 %v4746_v45, %v4858_v31  ;;  %v2969_v51 = vmul.f32 %v2937_v0, %v2937_v0  ;;  %v3012_v57 = vsel %vm847_vm6, %v2967_v53, 0.0 }
 0x25e   : > { %v2940_v20 = vsub.f32 %v4752_v47, %v4858_v31  ;;  %v2970_v58 = vmul.f32 %v2938_v56, %v2938_v56  ;;  %v3014_v60 = vsel %vm847_vm6, %v2968_v54, 0.0  ;;  %v2941_v36 = vsub.f32 %v4762_v27, %v4858_v31 }
 0x25f   : > { %v2997_v17 = vadd.f32 %v2996_v15, %v2995_v12  ;;  %v2971_v1 = vmul.f32 %v2939_v62, %v2939_v62  ;;  %v3016_v3 = vsel %vm847_vm6, %v2969_v51, 0.0  ;;  %v2942_v45 = vsub.f32 %v4768_v13, %v4858_v31 }
 0x260   : > { %v2972_v5 = vmul.f32 %v2940_v20, %v2940_v20  ;;  %v3018_v63 = vsel %vm847_vm6, %v2970_v58, 0.0  ;;  %v2943_v47 = vsub.f32 %v4778_v21, %v4858_v31  ;;  %v2973_v41 = vmul.f32 %v2941_v36, %v2941_v36 }
 0x261   : > { %v2999_v23 = vadd.f32 %v2998_v19, %v2997_v17  ;;  %v3020_v12 = vsel %vm847_vm6, %v2971_v1, 0.0  ;;  %v2944_v27 = vsub.f32 %v4784_v28, %v4858_v31  ;;  %v2974_v14 = vmul.f32 %v2942_v45, %v2942_v45 }
 0x262   : > { %v3022_v15 = vsel %vm847_vm6, %v2972_v5, 0.0  ;;  %v2945_v13 = vsub.f32 %v4794_v35, %v4858_v31  ;;  %v2975_v8 = vmul.f32 %v2943_v47, %v2943_v47  ;;  %v3024_v18 = vsel %vm847_vm6, %v2973_v41, 0.0 }
 0x263   : > { %v3001_v29 = vadd.f32 %v3000_v26, %v2999_v23  ;;  %v2946_v21 = vsub.f32 %v4800_v61, %v4858_v31  ;;  %v2976_v23 = vmul.f32 %v2944_v27, %v2944_v27  ;;  %v3026_v16 = vsel %vm847_vm6, %v2974_v14, 0.0 }
 0x264   : > { %v2947_v28 = vsub.f32 %v4810_v32, %v4858_v31  ;;  %v2977_v26 = vmul.f32 %v2945_v13, %v2945_v13  ;;  %v2948_v35 = vsub.f32 %v4816_v22, %v4858_v31  ;;  %v2949_v61 = vsub.f32 %v4826_v40, %v4858_v31 }
 0x265   : > { %v3003_v30 = vadd.f32 %v3002_v38, %v3001_v29  ;;  %v3028_v29 = vsel %vm847_vm6, %v2975_v8, 0.0  ;;  %v2978_v10 = vmul.f32 %v2946_v21, %v2946_v21  ;;  %v3030_v38 = vsel %vm847_vm6, %v2976_v23, 0.0 }
 0x266   : > { %v2979_v34 = vmul.f32 %v2947_v28, %v2947_v28  ;;  %v3032_v33 = vsel %vm847_vm6, %v2977_v26, 0.0  ;;  %v2950_v32 = vsub.f32 %v4832_v50, %v4858_v31  ;;  %v2951_v22 = vsub.f32 %v4842_v2, %v4858_v31 }
 0x267   : > { %v3005_v43 = vadd.f32 %v3004_v42, %v3003_v30  ;;  %v3034_v9 = vsel %vm847_vm6, %v2978_v10, 0.0  ;;  %v2952_v40 = vsub.f32 %v4848_v7, %v4858_v31 }
 0x268   : > { %v2982_v53 = vmul.f32 %v2950_v32, %v2950_v32  ;;  %v2983_v50 = vmul.f32 %v2951_v22, %v2951_v22 }
 0x269   : > { %v3007_v49 = vadd.f32 %v3006_v46, %v3005_v43  ;;  %v2980_v43 = vmul.f32 %v2948_v35, %v2948_v35  ;;  %v2981_v46 = vmul.f32 %v2949_v61, %v2949_v61 }
 0x26a   : > { %v3042_v2 = vsel %vm847_vm6, %v2982_v53, 0.0  ;;  %v3044_v62 = vsel %vm847_vm6, %v2983_v50, 0.0 }
 0x26b   : > { %v3009_v11 = vadd.f32 %v3008_v39, %v3007_v49  ;;  %v3036_v49 = vsel %vm847_vm6, %v2979_v34, 0.0  ;;  %v3038_v39 = vsel %vm847_vm6, %v2980_v43, 0.0  ;;  %v3040_v56 = vsel %vm847_vm6, %v2981_v46, 0.0 }
 0x26d   : > { %v3011_v37 = vadd.f32 %v3010_v48, %v3009_v11  ;;  %v2984_v48 = vmul.f32 %v2952_v40, %v2952_v40 }
 0x26f   : > { %v3013_v55 = vadd.f32 %v3012_v57, %v3011_v37  ;;  %v3046_v57 = vsel %vm847_vm6, %v2984_v48, 0.0 }
 0x271   : > { %v3015_v59 = vadd.f32 %v3014_v60, %v3013_v55 }
 0x273   : > { %v3017_v52 = vadd.f32 %v3016_v3, %v3015_v59 }
 0x275   : > { %v3019_v6 = vadd.f32 %v3018_v63, %v3017_v52 }
 0x277   : > { %v3021_v4 = vadd.f32 %v3020_v12, %v3019_v6 }
 0x279   : > { %v3023_v17 = vadd.f32 %v3022_v15, %v3021_v4 }
 0x27b   : > { %v3025_v19 = vadd.f32 %v3024_v18, %v3023_v17 }
 0x27d   : > { %v3027_v24 = vadd.f32 %v3026_v16, %v3025_v19 }
 0x27f   : > { %v3029_v25 = vadd.f32 %v3028_v29, %v3027_v24 }
 0x281   : > { %v3031_v30 = vadd.f32 %v3030_v38, %v3029_v25 }
 0x283   : > { %v3033_v42 = vadd.f32 %v3032_v33, %v3031_v30 }
 0x285   : > { %v3035_v44 = vadd.f32 %v3034_v9, %v3033_v42 }
 0x287   : > { %v3037_v0 = vadd.f32 %v3036_v49, %v3035_v44 }
 0x289   : > { %v3039_v11 = vadd.f32 %v3038_v39, %v3037_v0 }
 0x28b   : > { %v3041_v54 = vadd.f32 %v3040_v56, %v3039_v11 }
 0x28d   : > { %v3043_v37 = vadd.f32 %v3042_v2, %v3041_v54 }
 0x28f   : > { %v3045_v51 = vadd.f32 %v3044_v62, %v3043_v37 }
 0x291   : > { %v3047_v55 = vadd.f32 %v3046_v57, %v3045_v51 }
 0x293   : > { %v3048_v7 = vrot.slane %v3047_v55, 4 }
 0x295   : > { %v3049_v20 = vadd.f32 %v3048_v7, %v3047_v55 }
 0x297   : > { %v3050_v58 = vrot.slane %v3049_v20, 2 }
 0x299   : > { %v3051_v60 = vadd.f32 %v3050_v58, %v3049_v20 }
 0x29b   : > { %v3052_v59 = vrot.slane %v3051_v60, 1 }
 0x29d   : > { %v3053_v36 = vadd.f32 %v3052_v59, %v3051_v60 }
 0x29f   : > { %v3055_v1 = vsel %vm429_vm3, %v4858_v31, %v3053_v36 }
 0x2a0   : > { %3057 = vst.msk [vmem:[%s225_s11] sm:$0x3] %vm3056_vm9, %v3055_v1 }
 0x2a1   : > { %3827 = shalt.err (!%p3824_p3)
}
 0x2a2   : > { %s3828_s28 = scalar_lea.hbm %s4961_s16, 32  ;;  %s3832_s8 = scalar_lea.hbm %s5010_s5, 64 }
 0x2a3   : > { %p3829_p4 = scmp.ne.s32.totalorder %s4961_s16, %s3828_s28  ;;  %p3833_p9 = scmp.lt.u32.totalorder %s4961_s16, %s5010_s5 }
 0x2a4   : > { %p3834_p10 = scmp.lt.u32.totalorder %s3832_s8, %s3828_s28  ;;  %p3836_p12 = scmp.lt.u32.totalorder %s3828_s28, %s4961_s16 }
 0x2a5   : > { %p3830_p7 = pnand %p3829_p4, %p3949_p5 }
 0x2a6   : > { %p3835_p11 = por %p3834_p10, %p3833_p9 }
 0x2a7   : > { %p3831_p8 = pneg %p3830_p7 }
 0x2a8   : > { %p3837_p13 = por %p3836_p12, %p3835_p11 }
 0x2aa   : > { %p3838_p0 = pnand %p3837_p13, %p3831_p8 }
 0x2ac   : > { %3841 = shalt.err (!%p3838_p0)
}
 0x2ad   : > { %3635 = dma.vmem_to_hbm [thread:$0]  (%p3949_p5), %s4963_s12, 32, %s4961_s16, %s3064_s17  }
 0x2ae PF: > { %p3641_p1 = scmp.ge.s32.totalorder %s3876_s21, 2  ;;  %s3100_s30 = sand.u32 1, %s3864_s18  }
 0x2af   : > { %s3101_s10 = scalar_lea.sflag [#allocation5], %s3100_s30 }
 0x2b0   : > { %p3638_p2 = pnand %p3641_p1, %p3953_p6 }
 0x2b2   : > { %3859 = dma.done.wait (!%p3638_p2), %s3101_s10, 32  }
 0x2b3   : > { %3861 = vsyncadd (!%p3638_p2), %s3101_s10, 4294967264  ;;  %p16_p3 = scmp.ge.s32.totalorder %s3936_s22, 4   ;;  %s5015_s18 = smov %s3868_s19 }
 0x2b4   : > { %s5016_s19 = smov %s3872_s20  ;;  %s5017_s20 = smov %s3947_s25 }
 0x2b5   : > { %s5018_s21 = smov %s3936_s22  ;;  %18 = sbr.rel (!%p16_p3) target bundleno = 3 (0x3), region = 87 }
 0x2bc   :  { %3106 = vsyncpa [#allocation5], 1 }
 0x2bd   :  { %3108 = vsyncpa [#allocation5 + $0x1], 1 }

</bundles_post_ra>
